<compile_context>
chip_gen: v6e
topology: v6e:2x2x1
jax: 0.10.0
libtpu: 0.0.40
codegen_flags: <defaults>
</compile_context>

<pallas_src>
import jax
import jax.numpy as jnp
from jax.experimental import pallas as pl
from jax.experimental.pallas import tpu as pltpu

HID = 10               # hidden width of the MLP
LANES = 128            # lane width
MAX_TILE_ROWS = 512    # (512, 128) f32 tile = 256 KiB per in/out block

# Packed parameter vector layout (141 f32 scalars, PyTorch nn.Linear order):
#   w1[10] | b1[10] | w2[100] (row-major out,in) | b2[10] | w3[10] | b3[1]
_W1, _B1, _W2, _B2, _W3, _B3 = 0, 10, 20, 120, 130, 140
_NPARAMS = 141


def _round_up(a, m):
    return ((a + m - 1) // m) * m


def _mlp_kernel(w_ref, x_ref, o_ref):
    """w_ref: (141,) f32 in SMEM — every weight/bias read as a scalar.
    x_ref / o_ref: (TILE_R, 128) f32 in VMEM — batch dense on sublanes+lanes."""
    x = x_ref[...]                                            # (TILE_R, 128)

    # Layer 1 (in_features = 1): 10 scalar-broadcast FMAs + tanh, batch-dense.
    h1 = [jnp.tanh(w_ref[_W1 + j] * x + w_ref[_B1 + j]) for j in range(HID)]

    # Layer 2 (10x10) as 100 unrolled scalar FMAs on the VPU (a 10x10 f32 dot
    # would use <1% of the MXU and force a padded sublane layout), with
    # layer 3 (out_features = 1) accumulated on the fly so only h1 stays live.
    y = jnp.full(x.shape, w_ref[_B3], dtype=jnp.float32)
    for k in range(HID):
        acc = w_ref[_W2 + k * HID] * h1[0]
        for j in range(1, HID):
            acc = acc + w_ref[_W2 + k * HID + j] * h1[j]
        h2_k = jnp.tanh(acc + w_ref[_B2 + k])
        y = y + w_ref[_W3 + k] * h2_k

    o_ref[...] = y.astype(o_ref.dtype)


def ode_solver_forward(x, params, *, max_tile_rows=MAX_TILE_ROWS):
    """x: (N, 1) float32  ->  (N, 1) float32."""
    n = x.shape[0]

    packed = jnp.concatenate([
        params["w1"].reshape(-1), params["b1"].reshape(-1),
        params["w2"].reshape(-1), params["b2"].reshape(-1),
        params["w3"].reshape(-1), params["b3"].reshape(-1),
    ]).astype(jnp.float32)                                    # (141,)

    # Batch laid out dense on sublanes x lanes: (rows, 128). Adaptive tile so
    # tiny batches don't pad to a huge slab, large batches get big tiles
    # (amortizes the ~0.35 us per-grid-step overhead) and >=2 grid steps.
    rows = _round_up(max(n, 1), LANES) // LANES
    tile_r = min(max_tile_rows, _round_up(rows, 8))
    n_rows = _round_up(rows, tile_r)
    n_pad = n_rows * LANES

    x2d = jnp.pad(x.reshape(-1).astype(jnp.float32),
                  (0, n_pad - n)).reshape(n_rows, LANES)

    out2d = pl.pallas_call(
        _mlp_kernel,
        out_shape=jax.ShapeDtypeStruct((n_rows, LANES), jnp.float32),
        grid=(n_rows // tile_r,),
        in_specs=[
            pl.BlockSpec(memory_space=pltpu.MemorySpace.SMEM),  # packed weights
            pl.BlockSpec((tile_r, LANES), lambda i: (i, 0)),    # x tile (dense)
        ],
        out_specs=pl.BlockSpec((tile_r, LANES), lambda i: (i, 0)),
        compiler_params=pltpu.CompilerParams(
            dimension_semantics=("parallel",),
        ),
    )(packed, x2d)

    # Padded lanes compute tanh(b)-derived garbage; slice it off here.
    return out2d.reshape(-1)[:n].reshape(n, 1)


def init_params(key):
    """Deterministic init matching PyTorch nn.Linear (uniform +-1/sqrt(fan_in)),
    stored in native PyTorch layouts: W (out, in), b (out,)."""
    k1, k2, k3, k4, k5, k6 = jax.random.split(key, 6)

    def lin_init(kw, kb, fan_in, fan_out):
        bound = 1.0 / jnp.sqrt(jnp.float32(fan_in))
        w = jax.random.uniform(kw, (fan_out, fan_in), jnp.float32, -bound, bound)
        b = jax.random.uniform(kb, (fan_out,), jnp.float32, -bound, bound)
        return w, b

    w1, b1 = lin_init(k1, k2, 1, HID)      # (10, 1), (10,)
    w2, b2 = lin_init(k3, k4, HID, HID)    # (10, 10), (10,)
    w3, b3 = lin_init(k5, k6, HID, 1)      # (1, 10), (1,)
    return {"w1": w1, "b1": b1, "w2": w2, "b2": b2, "w3": w3, "b3": b3}


def _reference(x, p):
    """Pure-JAX f32 reference matching the PyTorch forward (no MXU matmuls,
    so it stays exact f32 like the kernel)."""
    h1 = jnp.tanh(x * p["w1"][:, 0][None, :] + p["b1"][None, :])            # (N, 10)
    h2 = jnp.tanh(jnp.sum(h1[:, None, :] * p["w2"][None, :, :], axis=-1)
                  + p["b2"][None, :])                                        # (N, 10)
    y = jnp.sum(h2 * p["w3"][0][None, :], axis=-1, keepdims=True) \
        + p["b3"][None, :]                                                   # (N, 1)
    return y


if __name__ == "__main__":
    key = jax.random.PRNGKey(0)
    kx, kp = jax.random.split(key)
    params = init_params(kp)

    for n in (8, 200):  # tiny ODE-style batch + a lane-padded batch
        x = jax.random.normal(jax.random.fold_in(kx, n), (n, 1), jnp.float32)
        out = jax.block_until_ready(ode_solver_forward(x, params))
        ref = _reference(x, params)
        assert out.shape == (n, 1)
        assert jnp.allclose(out, ref, atol=1e-5, rtol=1e-5), (n, out, ref)

    print("KERNEL_OK")
</pallas_src>

<mosaic_0001>
module attributes {stable_mosaic.version = 11 : i64} {
  func.func @_mlp_kernel(%arg0: i32, %arg1: memref<141xf32, #tpu.memory_space<smem>>, %arg2: memref<8x128xf32, #tpu.memory_space<vmem>>, %arg3: memref<8x128xf32, #tpu.memory_space<vmem>>) attributes {dimension_semantics = [#tpu.dimension_semantics<parallel>], iteration_bounds = array<i64: 1>, scalar_prefetch = 0 : i64, scratch_operands = 0 : i64, tpu.core_type = #tpu.core_type<tc>, window_params = [{transform_indices = @transform_0, window_bounds = array<i64: 141>}, {transform_indices = @transform_1, window_bounds = array<i64: 8, 128>}, {transform_indices = @transform_2, window_bounds = array<i64: 8, 128>}]} {
    %c0 = arith.constant 0 : index
    %c0_0 = arith.constant 0 : index
    %0 = vector.load %arg2[%c0, %c0_0] : memref<8x128xf32, #tpu.memory_space<vmem>>, vector<8x128xf32>
    %c0_1 = arith.constant 0 : index
    %1 = memref.load %arg1[%c0_1] : memref<141xf32, #tpu.memory_space<smem>>
    %2 = vector.broadcast %1 : f32 to vector<8x128xf32>
    %3 = arith.mulf %2, %0 : vector<8x128xf32>
    %c10 = arith.constant 10 : index
    %4 = memref.load %arg1[%c10] : memref<141xf32, #tpu.memory_space<smem>>
    %5 = vector.broadcast %4 : f32 to vector<8x128xf32>
    %6 = arith.addf %3, %5 : vector<8x128xf32>
    %7 = math.tanh %6 : vector<8x128xf32>
    %c1 = arith.constant 1 : index
    %8 = memref.load %arg1[%c1] : memref<141xf32, #tpu.memory_space<smem>>
    %9 = vector.broadcast %8 : f32 to vector<8x128xf32>
    %10 = arith.mulf %9, %0 : vector<8x128xf32>
    %c11 = arith.constant 11 : index
    %11 = memref.load %arg1[%c11] : memref<141xf32, #tpu.memory_space<smem>>
    %12 = vector.broadcast %11 : f32 to vector<8x128xf32>
    %13 = arith.addf %10, %12 : vector<8x128xf32>
    %14 = math.tanh %13 : vector<8x128xf32>
    %c2 = arith.constant 2 : index
    %15 = memref.load %arg1[%c2] : memref<141xf32, #tpu.memory_space<smem>>
    %16 = vector.broadcast %15 : f32 to vector<8x128xf32>
    %17 = arith.mulf %16, %0 : vector<8x128xf32>
    %c12 = arith.constant 12 : index
    %18 = memref.load %arg1[%c12] : memref<141xf32, #tpu.memory_space<smem>>
    %19 = vector.broadcast %18 : f32 to vector<8x128xf32>
    %20 = arith.addf %17, %19 : vector<8x128xf32>
    %21 = math.tanh %20 : vector<8x128xf32>
    %c3 = arith.constant 3 : index
    %22 = memref.load %arg1[%c3] : memref<141xf32, #tpu.memory_space<smem>>
    %23 = vector.broadcast %22 : f32 to vector<8x128xf32>
    %24 = arith.mulf %23, %0 : vector<8x128xf32>
    %c13 = arith.constant 13 : index
    %25 = memref.load %arg1[%c13] : memref<141xf32, #tpu.memory_space<smem>>
    %26 = vector.broadcast %25 : f32 to vector<8x128xf32>
    %27 = arith.addf %24, %26 : vector<8x128xf32>
    %28 = math.tanh %27 : vector<8x128xf32>
    %c4 = arith.constant 4 : index
    %29 = memref.load %arg1[%c4] : memref<141xf32, #tpu.memory_space<smem>>
    %30 = vector.broadcast %29 : f32 to vector<8x128xf32>
    %31 = arith.mulf %30, %0 : vector<8x128xf32>
    %c14 = arith.constant 14 : index
    %32 = memref.load %arg1[%c14] : memref<141xf32, #tpu.memory_space<smem>>
    %33 = vector.broadcast %32 : f32 to vector<8x128xf32>
    %34 = arith.addf %31, %33 : vector<8x128xf32>
    %35 = math.tanh %34 : vector<8x128xf32>
    %c5 = arith.constant 5 : index
    %36 = memref.load %arg1[%c5] : memref<141xf32, #tpu.memory_space<smem>>
    %37 = vector.broadcast %36 : f32 to vector<8x128xf32>
    %38 = arith.mulf %37, %0 : vector<8x128xf32>
    %c15 = arith.constant 15 : index
    %39 = memref.load %arg1[%c15] : memref<141xf32, #tpu.memory_space<smem>>
    %40 = vector.broadcast %39 : f32 to vector<8x128xf32>
    %41 = arith.addf %38, %40 : vector<8x128xf32>
    %42 = math.tanh %41 : vector<8x128xf32>
    %c6 = arith.constant 6 : index
    %43 = memref.load %arg1[%c6] : memref<141xf32, #tpu.memory_space<smem>>
    %44 = vector.broadcast %43 : f32 to vector<8x128xf32>
    %45 = arith.mulf %44, %0 : vector<8x128xf32>
    %c16 = arith.constant 16 : index
    %46 = memref.load %arg1[%c16] : memref<141xf32, #tpu.memory_space<smem>>
    %47 = vector.broadcast %46 : f32 to vector<8x128xf32>
    %48 = arith.addf %45, %47 : vector<8x128xf32>
    %49 = math.tanh %48 : vector<8x128xf32>
    %c7 = arith.constant 7 : index
    %50 = memref.load %arg1[%c7] : memref<141xf32, #tpu.memory_space<smem>>
    %51 = vector.broadcast %50 : f32 to vector<8x128xf32>
    %52 = arith.mulf %51, %0 : vector<8x128xf32>
    %c17 = arith.constant 17 : index
    %53 = memref.load %arg1[%c17] : memref<141xf32, #tpu.memory_space<smem>>
    %54 = vector.broadcast %53 : f32 to vector<8x128xf32>
    %55 = arith.addf %52, %54 : vector<8x128xf32>
    %56 = math.tanh %55 : vector<8x128xf32>
    %c8 = arith.constant 8 : index
    %57 = memref.load %arg1[%c8] : memref<141xf32, #tpu.memory_space<smem>>
    %58 = vector.broadcast %57 : f32 to vector<8x128xf32>
    %59 = arith.mulf %58, %0 : vector<8x128xf32>
    %c18 = arith.constant 18 : index
    %60 = memref.load %arg1[%c18] : memref<141xf32, #tpu.memory_space<smem>>
    %61 = vector.broadcast %60 : f32 to vector<8x128xf32>
    %62 = arith.addf %59, %61 : vector<8x128xf32>
    %63 = math.tanh %62 : vector<8x128xf32>
    %c9 = arith.constant 9 : index
    %64 = memref.load %arg1[%c9] : memref<141xf32, #tpu.memory_space<smem>>
    %65 = vector.broadcast %64 : f32 to vector<8x128xf32>
    %66 = arith.mulf %65, %0 : vector<8x128xf32>
    %c19 = arith.constant 19 : index
    %67 = memref.load %arg1[%c19] : memref<141xf32, #tpu.memory_space<smem>>
    %68 = vector.broadcast %67 : f32 to vector<8x128xf32>
    %69 = arith.addf %66, %68 : vector<8x128xf32>
    %70 = math.tanh %69 : vector<8x128xf32>
    %c140 = arith.constant 140 : index
    %71 = memref.load %arg1[%c140] : memref<141xf32, #tpu.memory_space<smem>>
    %72 = vector.broadcast %71 : f32 to vector<8x128xf32>
    %c20 = arith.constant 20 : index
    %73 = memref.load %arg1[%c20] : memref<141xf32, #tpu.memory_space<smem>>
    %74 = vector.broadcast %73 : f32 to vector<8x128xf32>
    %75 = arith.mulf %74, %7 : vector<8x128xf32>
    %c21 = arith.constant 21 : index
    %76 = memref.load %arg1[%c21] : memref<141xf32, #tpu.memory_space<smem>>
    %77 = vector.broadcast %76 : f32 to vector<8x128xf32>
    %78 = arith.mulf %77, %14 : vector<8x128xf32>
    %79 = arith.addf %75, %78 : vector<8x128xf32>
    %c22 = arith.constant 22 : index
    %80 = memref.load %arg1[%c22] : memref<141xf32, #tpu.memory_space<smem>>
    %81 = vector.broadcast %80 : f32 to vector<8x128xf32>
    %82 = arith.mulf %81, %21 : vector<8x128xf32>
    %83 = arith.addf %79, %82 : vector<8x128xf32>
    %c23 = arith.constant 23 : index
    %84 = memref.load %arg1[%c23] : memref<141xf32, #tpu.memory_space<smem>>
    %85 = vector.broadcast %84 : f32 to vector<8x128xf32>
    %86 = arith.mulf %85, %28 : vector<8x128xf32>
    %87 = arith.addf %83, %86 : vector<8x128xf32>
    %c24 = arith.constant 24 : index
    %88 = memref.load %arg1[%c24] : memref<141xf32, #tpu.memory_space<smem>>
    %89 = vector.broadcast %88 : f32 to vector<8x128xf32>
    %90 = arith.mulf %89, %35 : vector<8x128xf32>
    %91 = arith.addf %87, %90 : vector<8x128xf32>
    %c25 = arith.constant 25 : index
    %92 = memref.load %arg1[%c25] : memref<141xf32, #tpu.memory_space<smem>>
    %93 = vector.broadcast %92 : f32 to vector<8x128xf32>
    %94 = arith.mulf %93, %42 : vector<8x128xf32>
    %95 = arith.addf %91, %94 : vector<8x128xf32>
    %c26 = arith.constant 26 : index
    %96 = memref.load %arg1[%c26] : memref<141xf32, #tpu.memory_space<smem>>
    %97 = vector.broadcast %96 : f32 to vector<8x128xf32>
    %98 = arith.mulf %97, %49 : vector<8x128xf32>
    %99 = arith.addf %95, %98 : vector<8x128xf32>
    %c27 = arith.constant 27 : index
    %100 = memref.load %arg1[%c27] : memref<141xf32, #tpu.memory_space<smem>>
    %101 = vector.broadcast %100 : f32 to vector<8x128xf32>
    %102 = arith.mulf %101, %56 : vector<8x128xf32>
    %103 = arith.addf %99, %102 : vector<8x128xf32>
    %c28 = arith.constant 28 : index
    %104 = memref.load %arg1[%c28] : memref<141xf32, #tpu.memory_space<smem>>
    %105 = vector.broadcast %104 : f32 to vector<8x128xf32>
    %106 = arith.mulf %105, %63 : vector<8x128xf32>
    %107 = arith.addf %103, %106 : vector<8x128xf32>
    %c29 = arith.constant 29 : index
    %108 = memref.load %arg1[%c29] : memref<141xf32, #tpu.memory_space<smem>>
    %109 = vector.broadcast %108 : f32 to vector<8x128xf32>
    %110 = arith.mulf %109, %70 : vector<8x128xf32>
    %111 = arith.addf %107, %110 : vector<8x128xf32>
    %c120 = arith.constant 120 : index
    %112 = memref.load %arg1[%c120] : memref<141xf32, #tpu.memory_space<smem>>
    %113 = vector.broadcast %112 : f32 to vector<8x128xf32>
    %114 = arith.addf %111, %113 : vector<8x128xf32>
    %115 = math.tanh %114 : vector<8x128xf32>
    %c130 = arith.constant 130 : index
    %116 = memref.load %arg1[%c130] : memref<141xf32, #tpu.memory_space<smem>>
    %117 = vector.broadcast %116 : f32 to vector<8x128xf32>
    %118 = arith.mulf %117, %115 : vector<8x128xf32>
    %119 = arith.addf %72, %118 : vector<8x128xf32>
    %c30 = arith.constant 30 : index
    %120 = memref.load %arg1[%c30] : memref<141xf32, #tpu.memory_space<smem>>
    %121 = vector.broadcast %120 : f32 to vector<8x128xf32>
    %122 = arith.mulf %121, %7 : vector<8x128xf32>
    %c31 = arith.constant 31 : index
    %123 = memref.load %arg1[%c31] : memref<141xf32, #tpu.memory_space<smem>>
    %124 = vector.broadcast %123 : f32 to vector<8x128xf32>
    %125 = arith.mulf %124, %14 : vector<8x128xf32>
    %126 = arith.addf %122, %125 : vector<8x128xf32>
    %c32 = arith.constant 32 : index
    %127 = memref.load %arg1[%c32] : memref<141xf32, #tpu.memory_space<smem>>
    %128 = vector.broadcast %127 : f32 to vector<8x128xf32>
    %129 = arith.mulf %128, %21 : vector<8x128xf32>
    %130 = arith.addf %126, %129 : vector<8x128xf32>
    %c33 = arith.constant 33 : index
    %131 = memref.load %arg1[%c33] : memref<141xf32, #tpu.memory_space<smem>>
    %132 = vector.broadcast %131 : f32 to vector<8x128xf32>
    %133 = arith.mulf %132, %28 : vector<8x128xf32>
    %134 = arith.addf %130, %133 : vector<8x128xf32>
    %c34 = arith.constant 34 : index
    %135 = memref.load %arg1[%c34] : memref<141xf32, #tpu.memory_space<smem>>
    %136 = vector.broadcast %135 : f32 to vector<8x128xf32>
    %137 = arith.mulf %136, %35 : vector<8x128xf32>
    %138 = arith.addf %134, %137 : vector<8x128xf32>
    %c35 = arith.constant 35 : index
    %139 = memref.load %arg1[%c35] : memref<141xf32, #tpu.memory_space<smem>>
    %140 = vector.broadcast %139 : f32 to vector<8x128xf32>
    %141 = arith.mulf %140, %42 : vector<8x128xf32>
    %142 = arith.addf %138, %141 : vector<8x128xf32>
    %c36 = arith.constant 36 : index
    %143 = memref.load %arg1[%c36] : memref<141xf32, #tpu.memory_space<smem>>
    %144 = vector.broadcast %143 : f32 to vector<8x128xf32>
    %145 = arith.mulf %144, %49 : vector<8x128xf32>
    %146 = arith.addf %142, %145 : vector<8x128xf32>
    %c37 = arith.constant 37 : index
    %147 = memref.load %arg1[%c37] : memref<141xf32, #tpu.memory_space<smem>>
    %148 = vector.broadcast %147 : f32 to vector<8x128xf32>
    %149 = arith.mulf %148, %56 : vector<8x128xf32>
    %150 = arith.addf %146, %149 : vector<8x128xf32>
    %c38 = arith.constant 38 : index
    %151 = memref.load %arg1[%c38] : memref<141xf32, #tpu.memory_space<smem>>
    %152 = vector.broadcast %151 : f32 to vector<8x128xf32>
    %153 = arith.mulf %152, %63 : vector<8x128xf32>
    %154 = arith.addf %150, %153 : vector<8x128xf32>
    %c39 = arith.constant 39 : index
    %155 = memref.load %arg1[%c39] : memref<141xf32, #tpu.memory_space<smem>>
    %156 = vector.broadcast %155 : f32 to vector<8x128xf32>
    %157 = arith.mulf %156, %70 : vector<8x128xf32>
    %158 = arith.addf %154, %157 : vector<8x128xf32>
    %c121 = arith.constant 121 : index
    %159 = memref.load %arg1[%c121] : memref<141xf32, #tpu.memory_space<smem>>
    %160 = vector.broadcast %159 : f32 to vector<8x128xf32>
    %161 = arith.addf %158, %160 : vector<8x128xf32>
    %162 = math.tanh %161 : vector<8x128xf32>
    %c131 = arith.constant 131 : index
    %163 = memref.load %arg1[%c131] : memref<141xf32, #tpu.memory_space<smem>>
    %164 = vector.broadcast %163 : f32 to vector<8x128xf32>
    %165 = arith.mulf %164, %162 : vector<8x128xf32>
    %166 = arith.addf %119, %165 : vector<8x128xf32>
    %c40 = arith.constant 40 : index
    %167 = memref.load %arg1[%c40] : memref<141xf32, #tpu.memory_space<smem>>
    %168 = vector.broadcast %167 : f32 to vector<8x128xf32>
    %169 = arith.mulf %168, %7 : vector<8x128xf32>
    %c41 = arith.constant 41 : index
    %170 = memref.load %arg1[%c41] : memref<141xf32, #tpu.memory_space<smem>>
    %171 = vector.broadcast %170 : f32 to vector<8x128xf32>
    %172 = arith.mulf %171, %14 : vector<8x128xf32>
    %173 = arith.addf %169, %172 : vector<8x128xf32>
    %c42 = arith.constant 42 : index
    %174 = memref.load %arg1[%c42] : memref<141xf32, #tpu.memory_space<smem>>
    %175 = vector.broadcast %174 : f32 to vector<8x128xf32>
    %176 = arith.mulf %175, %21 : vector<8x128xf32>
    %177 = arith.addf %173, %176 : vector<8x128xf32>
    %c43 = arith.constant 43 : index
    %178 = memref.load %arg1[%c43] : memref<141xf32, #tpu.memory_space<smem>>
    %179 = vector.broadcast %178 : f32 to vector<8x128xf32>
    %180 = arith.mulf %179, %28 : vector<8x128xf32>
    %181 = arith.addf %177, %180 : vector<8x128xf32>
    %c44 = arith.constant 44 : index
    %182 = memref.load %arg1[%c44] : memref<141xf32, #tpu.memory_space<smem>>
    %183 = vector.broadcast %182 : f32 to vector<8x128xf32>
    %184 = arith.mulf %183, %35 : vector<8x128xf32>
    %185 = arith.addf %181, %184 : vector<8x128xf32>
    %c45 = arith.constant 45 : index
    %186 = memref.load %arg1[%c45] : memref<141xf32, #tpu.memory_space<smem>>
    %187 = vector.broadcast %186 : f32 to vector<8x128xf32>
    %188 = arith.mulf %187, %42 : vector<8x128xf32>
    %189 = arith.addf %185, %188 : vector<8x128xf32>
    %c46 = arith.constant 46 : index
    %190 = memref.load %arg1[%c46] : memref<141xf32, #tpu.memory_space<smem>>
    %191 = vector.broadcast %190 : f32 to vector<8x128xf32>
    %192 = arith.mulf %191, %49 : vector<8x128xf32>
    %193 = arith.addf %189, %192 : vector<8x128xf32>
    %c47 = arith.constant 47 : index
    %194 = memref.load %arg1[%c47] : memref<141xf32, #tpu.memory_space<smem>>
    %195 = vector.broadcast %194 : f32 to vector<8x128xf32>
    %196 = arith.mulf %195, %56 : vector<8x128xf32>
    %197 = arith.addf %193, %196 : vector<8x128xf32>
    %c48 = arith.constant 48 : index
    %198 = memref.load %arg1[%c48] : memref<141xf32, #tpu.memory_space<smem>>
    %199 = vector.broadcast %198 : f32 to vector<8x128xf32>
    %200 = arith.mulf %199, %63 : vector<8x128xf32>
    %201 = arith.addf %197, %200 : vector<8x128xf32>
    %c49 = arith.constant 49 : index
    %202 = memref.load %arg1[%c49] : memref<141xf32, #tpu.memory_space<smem>>
    %203 = vector.broadcast %202 : f32 to vector<8x128xf32>
    %204 = arith.mulf %203, %70 : vector<8x128xf32>
    %205 = arith.addf %201, %204 : vector<8x128xf32>
    %c122 = arith.constant 122 : index
    %206 = memref.load %arg1[%c122] : memref<141xf32, #tpu.memory_space<smem>>
    %207 = vector.broadcast %206 : f32 to vector<8x128xf32>
    %208 = arith.addf %205, %207 : vector<8x128xf32>
    %209 = math.tanh %208 : vector<8x128xf32>
    %c132 = arith.constant 132 : index
    %210 = memref.load %arg1[%c132] : memref<141xf32, #tpu.memory_space<smem>>
    %211 = vector.broadcast %210 : f32 to vector<8x128xf32>
    %212 = arith.mulf %211, %209 : vector<8x128xf32>
    %213 = arith.addf %166, %212 : vector<8x128xf32>
    %c50 = arith.constant 50 : index
    %214 = memref.load %arg1[%c50] : memref<141xf32, #tpu.memory_space<smem>>
    %215 = vector.broadcast %214 : f32 to vector<8x128xf32>
    %216 = arith.mulf %215, %7 : vector<8x128xf32>
    %c51 = arith.constant 51 : index
    %217 = memref.load %arg1[%c51] : memref<141xf32, #tpu.memory_space<smem>>
    %218 = vector.broadcast %217 : f32 to vector<8x128xf32>
    %219 = arith.mulf %218, %14 : vector<8x128xf32>
    %220 = arith.addf %216, %219 : vector<8x128xf32>
    %c52 = arith.constant 52 : index
    %221 = memref.load %arg1[%c52] : memref<141xf32, #tpu.memory_space<smem>>
    %222 = vector.broadcast %221 : f32 to vector<8x128xf32>
    %223 = arith.mulf %222, %21 : vector<8x128xf32>
    %224 = arith.addf %220, %223 : vector<8x128xf32>
    %c53 = arith.constant 53 : index
    %225 = memref.load %arg1[%c53] : memref<141xf32, #tpu.memory_space<smem>>
    %226 = vector.broadcast %225 : f32 to vector<8x128xf32>
    %227 = arith.mulf %226, %28 : vector<8x128xf32>
    %228 = arith.addf %224, %227 : vector<8x128xf32>
    %c54 = arith.constant 54 : index
    %229 = memref.load %arg1[%c54] : memref<141xf32, #tpu.memory_space<smem>>
    %230 = vector.broadcast %229 : f32 to vector<8x128xf32>
    %231 = arith.mulf %230, %35 : vector<8x128xf32>
    %232 = arith.addf %228, %231 : vector<8x128xf32>
    %c55 = arith.constant 55 : index
    %233 = memref.load %arg1[%c55] : memref<141xf32, #tpu.memory_space<smem>>
    %234 = vector.broadcast %233 : f32 to vector<8x128xf32>
    %235 = arith.mulf %234, %42 : vector<8x128xf32>
    %236 = arith.addf %232, %235 : vector<8x128xf32>
    %c56 = arith.constant 56 : index
    %237 = memref.load %arg1[%c56] : memref<141xf32, #tpu.memory_space<smem>>
    %238 = vector.broadcast %237 : f32 to vector<8x128xf32>
    %239 = arith.mulf %238, %49 : vector<8x128xf32>
    %240 = arith.addf %236, %239 : vector<8x128xf32>
    %c57 = arith.constant 57 : index
    %241 = memref.load %arg1[%c57] : memref<141xf32, #tpu.memory_space<smem>>
    %242 = vector.broadcast %241 : f32 to vector<8x128xf32>
    %243 = arith.mulf %242, %56 : vector<8x128xf32>
    %244 = arith.addf %240, %243 : vector<8x128xf32>
    %c58 = arith.constant 58 : index
    %245 = memref.load %arg1[%c58] : memref<141xf32, #tpu.memory_space<smem>>
    %246 = vector.broadcast %245 : f32 to vector<8x128xf32>
    %247 = arith.mulf %246, %63 : vector<8x128xf32>
    %248 = arith.addf %244, %247 : vector<8x128xf32>
    %c59 = arith.constant 59 : index
    %249 = memref.load %arg1[%c59] : memref<141xf32, #tpu.memory_space<smem>>
    %250 = vector.broadcast %249 : f32 to vector<8x128xf32>
    %251 = arith.mulf %250, %70 : vector<8x128xf32>
    %252 = arith.addf %248, %251 : vector<8x128xf32>
    %c123 = arith.constant 123 : index
    %253 = memref.load %arg1[%c123] : memref<141xf32, #tpu.memory_space<smem>>
    %254 = vector.broadcast %253 : f32 to vector<8x128xf32>
    %255 = arith.addf %252, %254 : vector<8x128xf32>
    %256 = math.tanh %255 : vector<8x128xf32>
    %c133 = arith.constant 133 : index
    %257 = memref.load %arg1[%c133] : memref<141xf32, #tpu.memory_space<smem>>
    %258 = vector.broadcast %257 : f32 to vector<8x128xf32>
    %259 = arith.mulf %258, %256 : vector<8x128xf32>
    %260 = arith.addf %213, %259 : vector<8x128xf32>
    %c60 = arith.constant 60 : index
    %261 = memref.load %arg1[%c60] : memref<141xf32, #tpu.memory_space<smem>>
    %262 = vector.broadcast %261 : f32 to vector<8x128xf32>
    %263 = arith.mulf %262, %7 : vector<8x128xf32>
    %c61 = arith.constant 61 : index
    %264 = memref.load %arg1[%c61] : memref<141xf32, #tpu.memory_space<smem>>
    %265 = vector.broadcast %264 : f32 to vector<8x128xf32>
    %266 = arith.mulf %265, %14 : vector<8x128xf32>
    %267 = arith.addf %263, %266 : vector<8x128xf32>
    %c62 = arith.constant 62 : index
    %268 = memref.load %arg1[%c62] : memref<141xf32, #tpu.memory_space<smem>>
    %269 = vector.broadcast %268 : f32 to vector<8x128xf32>
    %270 = arith.mulf %269, %21 : vector<8x128xf32>
    %271 = arith.addf %267, %270 : vector<8x128xf32>
    %c63 = arith.constant 63 : index
    %272 = memref.load %arg1[%c63] : memref<141xf32, #tpu.memory_space<smem>>
    %273 = vector.broadcast %272 : f32 to vector<8x128xf32>
    %274 = arith.mulf %273, %28 : vector<8x128xf32>
    %275 = arith.addf %271, %274 : vector<8x128xf32>
    %c64 = arith.constant 64 : index
    %276 = memref.load %arg1[%c64] : memref<141xf32, #tpu.memory_space<smem>>
    %277 = vector.broadcast %276 : f32 to vector<8x128xf32>
    %278 = arith.mulf %277, %35 : vector<8x128xf32>
    %279 = arith.addf %275, %278 : vector<8x128xf32>
    %c65 = arith.constant 65 : index
    %280 = memref.load %arg1[%c65] : memref<141xf32, #tpu.memory_space<smem>>
    %281 = vector.broadcast %280 : f32 to vector<8x128xf32>
    %282 = arith.mulf %281, %42 : vector<8x128xf32>
    %283 = arith.addf %279, %282 : vector<8x128xf32>
    %c66 = arith.constant 66 : index
    %284 = memref.load %arg1[%c66] : memref<141xf32, #tpu.memory_space<smem>>
    %285 = vector.broadcast %284 : f32 to vector<8x128xf32>
    %286 = arith.mulf %285, %49 : vector<8x128xf32>
    %287 = arith.addf %283, %286 : vector<8x128xf32>
    %c67 = arith.constant 67 : index
    %288 = memref.load %arg1[%c67] : memref<141xf32, #tpu.memory_space<smem>>
    %289 = vector.broadcast %288 : f32 to vector<8x128xf32>
    %290 = arith.mulf %289, %56 : vector<8x128xf32>
    %291 = arith.addf %287, %290 : vector<8x128xf32>
    %c68 = arith.constant 68 : index
    %292 = memref.load %arg1[%c68] : memref<141xf32, #tpu.memory_space<smem>>
    %293 = vector.broadcast %292 : f32 to vector<8x128xf32>
    %294 = arith.mulf %293, %63 : vector<8x128xf32>
    %295 = arith.addf %291, %294 : vector<8x128xf32>
    %c69 = arith.constant 69 : index
    %296 = memref.load %arg1[%c69] : memref<141xf32, #tpu.memory_space<smem>>
    %297 = vector.broadcast %296 : f32 to vector<8x128xf32>
    %298 = arith.mulf %297, %70 : vector<8x128xf32>
    %299 = arith.addf %295, %298 : vector<8x128xf32>
    %c124 = arith.constant 124 : index
    %300 = memref.load %arg1[%c124] : memref<141xf32, #tpu.memory_space<smem>>
    %301 = vector.broadcast %300 : f32 to vector<8x128xf32>
    %302 = arith.addf %299, %301 : vector<8x128xf32>
    %303 = math.tanh %302 : vector<8x128xf32>
    %c134 = arith.constant 134 : index
    %304 = memref.load %arg1[%c134] : memref<141xf32, #tpu.memory_space<smem>>
    %305 = vector.broadcast %304 : f32 to vector<8x128xf32>
    %306 = arith.mulf %305, %303 : vector<8x128xf32>
    %307 = arith.addf %260, %306 : vector<8x128xf32>
    %c70 = arith.constant 70 : index
    %308 = memref.load %arg1[%c70] : memref<141xf32, #tpu.memory_space<smem>>
    %309 = vector.broadcast %308 : f32 to vector<8x128xf32>
    %310 = arith.mulf %309, %7 : vector<8x128xf32>
    %c71 = arith.constant 71 : index
    %311 = memref.load %arg1[%c71] : memref<141xf32, #tpu.memory_space<smem>>
    %312 = vector.broadcast %311 : f32 to vector<8x128xf32>
    %313 = arith.mulf %312, %14 : vector<8x128xf32>
    %314 = arith.addf %310, %313 : vector<8x128xf32>
    %c72 = arith.constant 72 : index
    %315 = memref.load %arg1[%c72] : memref<141xf32, #tpu.memory_space<smem>>
    %316 = vector.broadcast %315 : f32 to vector<8x128xf32>
    %317 = arith.mulf %316, %21 : vector<8x128xf32>
    %318 = arith.addf %314, %317 : vector<8x128xf32>
    %c73 = arith.constant 73 : index
    %319 = memref.load %arg1[%c73] : memref<141xf32, #tpu.memory_space<smem>>
    %320 = vector.broadcast %319 : f32 to vector<8x128xf32>
    %321 = arith.mulf %320, %28 : vector<8x128xf32>
    %322 = arith.addf %318, %321 : vector<8x128xf32>
    %c74 = arith.constant 74 : index
    %323 = memref.load %arg1[%c74] : memref<141xf32, #tpu.memory_space<smem>>
    %324 = vector.broadcast %323 : f32 to vector<8x128xf32>
    %325 = arith.mulf %324, %35 : vector<8x128xf32>
    %326 = arith.addf %322, %325 : vector<8x128xf32>
    %c75 = arith.constant 75 : index
    %327 = memref.load %arg1[%c75] : memref<141xf32, #tpu.memory_space<smem>>
    %328 = vector.broadcast %327 : f32 to vector<8x128xf32>
    %329 = arith.mulf %328, %42 : vector<8x128xf32>
    %330 = arith.addf %326, %329 : vector<8x128xf32>
    %c76 = arith.constant 76 : index
    %331 = memref.load %arg1[%c76] : memref<141xf32, #tpu.memory_space<smem>>
    %332 = vector.broadcast %331 : f32 to vector<8x128xf32>
    %333 = arith.mulf %332, %49 : vector<8x128xf32>
    %334 = arith.addf %330, %333 : vector<8x128xf32>
    %c77 = arith.constant 77 : index
    %335 = memref.load %arg1[%c77] : memref<141xf32, #tpu.memory_space<smem>>
    %336 = vector.broadcast %335 : f32 to vector<8x128xf32>
    %337 = arith.mulf %336, %56 : vector<8x128xf32>
    %338 = arith.addf %334, %337 : vector<8x128xf32>
    %c78 = arith.constant 78 : index
    %339 = memref.load %arg1[%c78] : memref<141xf32, #tpu.memory_space<smem>>
    %340 = vector.broadcast %339 : f32 to vector<8x128xf32>
    %341 = arith.mulf %340, %63 : vector<8x128xf32>
    %342 = arith.addf %338, %341 : vector<8x128xf32>
    %c79 = arith.constant 79 : index
    %343 = memref.load %arg1[%c79] : memref<141xf32, #tpu.memory_space<smem>>
    %344 = vector.broadcast %343 : f32 to vector<8x128xf32>
    %345 = arith.mulf %344, %70 : vector<8x128xf32>
    %346 = arith.addf %342, %345 : vector<8x128xf32>
    %c125 = arith.constant 125 : index
    %347 = memref.load %arg1[%c125] : memref<141xf32, #tpu.memory_space<smem>>
    %348 = vector.broadcast %347 : f32 to vector<8x128xf32>
    %349 = arith.addf %346, %348 : vector<8x128xf32>
    %350 = math.tanh %349 : vector<8x128xf32>
    %c135 = arith.constant 135 : index
    %351 = memref.load %arg1[%c135] : memref<141xf32, #tpu.memory_space<smem>>
    %352 = vector.broadcast %351 : f32 to vector<8x128xf32>
    %353 = arith.mulf %352, %350 : vector<8x128xf32>
    %354 = arith.addf %307, %353 : vector<8x128xf32>
    %c80 = arith.constant 80 : index
    %355 = memref.load %arg1[%c80] : memref<141xf32, #tpu.memory_space<smem>>
    %356 = vector.broadcast %355 : f32 to vector<8x128xf32>
    %357 = arith.mulf %356, %7 : vector<8x128xf32>
    %c81 = arith.constant 81 : index
    %358 = memref.load %arg1[%c81] : memref<141xf32, #tpu.memory_space<smem>>
    %359 = vector.broadcast %358 : f32 to vector<8x128xf32>
    %360 = arith.mulf %359, %14 : vector<8x128xf32>
    %361 = arith.addf %357, %360 : vector<8x128xf32>
    %c82 = arith.constant 82 : index
    %362 = memref.load %arg1[%c82] : memref<141xf32, #tpu.memory_space<smem>>
    %363 = vector.broadcast %362 : f32 to vector<8x128xf32>
    %364 = arith.mulf %363, %21 : vector<8x128xf32>
    %365 = arith.addf %361, %364 : vector<8x128xf32>
    %c83 = arith.constant 83 : index
    %366 = memref.load %arg1[%c83] : memref<141xf32, #tpu.memory_space<smem>>
    %367 = vector.broadcast %366 : f32 to vector<8x128xf32>
    %368 = arith.mulf %367, %28 : vector<8x128xf32>
    %369 = arith.addf %365, %368 : vector<8x128xf32>
    %c84 = arith.constant 84 : index
    %370 = memref.load %arg1[%c84] : memref<141xf32, #tpu.memory_space<smem>>
    %371 = vector.broadcast %370 : f32 to vector<8x128xf32>
    %372 = arith.mulf %371, %35 : vector<8x128xf32>
    %373 = arith.addf %369, %372 : vector<8x128xf32>
    %c85 = arith.constant 85 : index
    %374 = memref.load %arg1[%c85] : memref<141xf32, #tpu.memory_space<smem>>
    %375 = vector.broadcast %374 : f32 to vector<8x128xf32>
    %376 = arith.mulf %375, %42 : vector<8x128xf32>
    %377 = arith.addf %373, %376 : vector<8x128xf32>
    %c86 = arith.constant 86 : index
    %378 = memref.load %arg1[%c86] : memref<141xf32, #tpu.memory_space<smem>>
    %379 = vector.broadcast %378 : f32 to vector<8x128xf32>
    %380 = arith.mulf %379, %49 : vector<8x128xf32>
    %381 = arith.addf %377, %380 : vector<8x128xf32>
    %c87 = arith.constant 87 : index
    %382 = memref.load %arg1[%c87] : memref<141xf32, #tpu.memory_space<smem>>
    %383 = vector.broadcast %382 : f32 to vector<8x128xf32>
    %384 = arith.mulf %383, %56 : vector<8x128xf32>
    %385 = arith.addf %381, %384 : vector<8x128xf32>
    %c88 = arith.constant 88 : index
    %386 = memref.load %arg1[%c88] : memref<141xf32, #tpu.memory_space<smem>>
    %387 = vector.broadcast %386 : f32 to vector<8x128xf32>
    %388 = arith.mulf %387, %63 : vector<8x128xf32>
    %389 = arith.addf %385, %388 : vector<8x128xf32>
    %c89 = arith.constant 89 : index
    %390 = memref.load %arg1[%c89] : memref<141xf32, #tpu.memory_space<smem>>
    %391 = vector.broadcast %390 : f32 to vector<8x128xf32>
    %392 = arith.mulf %391, %70 : vector<8x128xf32>
    %393 = arith.addf %389, %392 : vector<8x128xf32>
    %c126 = arith.constant 126 : index
    %394 = memref.load %arg1[%c126] : memref<141xf32, #tpu.memory_space<smem>>
    %395 = vector.broadcast %394 : f32 to vector<8x128xf32>
    %396 = arith.addf %393, %395 : vector<8x128xf32>
    %397 = math.tanh %396 : vector<8x128xf32>
    %c136 = arith.constant 136 : index
    %398 = memref.load %arg1[%c136] : memref<141xf32, #tpu.memory_space<smem>>
    %399 = vector.broadcast %398 : f32 to vector<8x128xf32>
    %400 = arith.mulf %399, %397 : vector<8x128xf32>
    %401 = arith.addf %354, %400 : vector<8x128xf32>
    %c90 = arith.constant 90 : index
    %402 = memref.load %arg1[%c90] : memref<141xf32, #tpu.memory_space<smem>>
    %403 = vector.broadcast %402 : f32 to vector<8x128xf32>
    %404 = arith.mulf %403, %7 : vector<8x128xf32>
    %c91 = arith.constant 91 : index
    %405 = memref.load %arg1[%c91] : memref<141xf32, #tpu.memory_space<smem>>
    %406 = vector.broadcast %405 : f32 to vector<8x128xf32>
    %407 = arith.mulf %406, %14 : vector<8x128xf32>
    %408 = arith.addf %404, %407 : vector<8x128xf32>
    %c92 = arith.constant 92 : index
    %409 = memref.load %arg1[%c92] : memref<141xf32, #tpu.memory_space<smem>>
    %410 = vector.broadcast %409 : f32 to vector<8x128xf32>
    %411 = arith.mulf %410, %21 : vector<8x128xf32>
    %412 = arith.addf %408, %411 : vector<8x128xf32>
    %c93 = arith.constant 93 : index
    %413 = memref.load %arg1[%c93] : memref<141xf32, #tpu.memory_space<smem>>
    %414 = vector.broadcast %413 : f32 to vector<8x128xf32>
    %415 = arith.mulf %414, %28 : vector<8x128xf32>
    %416 = arith.addf %412, %415 : vector<8x128xf32>
    %c94 = arith.constant 94 : index
    %417 = memref.load %arg1[%c94] : memref<141xf32, #tpu.memory_space<smem>>
    %418 = vector.broadcast %417 : f32 to vector<8x128xf32>
    %419 = arith.mulf %418, %35 : vector<8x128xf32>
    %420 = arith.addf %416, %419 : vector<8x128xf32>
    %c95 = arith.constant 95 : index
    %421 = memref.load %arg1[%c95] : memref<141xf32, #tpu.memory_space<smem>>
    %422 = vector.broadcast %421 : f32 to vector<8x128xf32>
    %423 = arith.mulf %422, %42 : vector<8x128xf32>
    %424 = arith.addf %420, %423 : vector<8x128xf32>
    %c96 = arith.constant 96 : index
    %425 = memref.load %arg1[%c96] : memref<141xf32, #tpu.memory_space<smem>>
    %426 = vector.broadcast %425 : f32 to vector<8x128xf32>
    %427 = arith.mulf %426, %49 : vector<8x128xf32>
    %428 = arith.addf %424, %427 : vector<8x128xf32>
    %c97 = arith.constant 97 : index
    %429 = memref.load %arg1[%c97] : memref<141xf32, #tpu.memory_space<smem>>
    %430 = vector.broadcast %429 : f32 to vector<8x128xf32>
    %431 = arith.mulf %430, %56 : vector<8x128xf32>
    %432 = arith.addf %428, %431 : vector<8x128xf32>
    %c98 = arith.constant 98 : index
    %433 = memref.load %arg1[%c98] : memref<141xf32, #tpu.memory_space<smem>>
    %434 = vector.broadcast %433 : f32 to vector<8x128xf32>
    %435 = arith.mulf %434, %63 : vector<8x128xf32>
    %436 = arith.addf %432, %435 : vector<8x128xf32>
    %c99 = arith.constant 99 : index
    %437 = memref.load %arg1[%c99] : memref<141xf32, #tpu.memory_space<smem>>
    %438 = vector.broadcast %437 : f32 to vector<8x128xf32>
    %439 = arith.mulf %438, %70 : vector<8x128xf32>
    %440 = arith.addf %436, %439 : vector<8x128xf32>
    %c127 = arith.constant 127 : index
    %441 = memref.load %arg1[%c127] : memref<141xf32, #tpu.memory_space<smem>>
    %442 = vector.broadcast %441 : f32 to vector<8x128xf32>
    %443 = arith.addf %440, %442 : vector<8x128xf32>
    %444 = math.tanh %443 : vector<8x128xf32>
    %c137 = arith.constant 137 : index
    %445 = memref.load %arg1[%c137] : memref<141xf32, #tpu.memory_space<smem>>
    %446 = vector.broadcast %445 : f32 to vector<8x128xf32>
    %447 = arith.mulf %446, %444 : vector<8x128xf32>
    %448 = arith.addf %401, %447 : vector<8x128xf32>
    %c100 = arith.constant 100 : index
    %449 = memref.load %arg1[%c100] : memref<141xf32, #tpu.memory_space<smem>>
    %450 = vector.broadcast %449 : f32 to vector<8x128xf32>
    %451 = arith.mulf %450, %7 : vector<8x128xf32>
    %c101 = arith.constant 101 : index
    %452 = memref.load %arg1[%c101] : memref<141xf32, #tpu.memory_space<smem>>
    %453 = vector.broadcast %452 : f32 to vector<8x128xf32>
    %454 = arith.mulf %453, %14 : vector<8x128xf32>
    %455 = arith.addf %451, %454 : vector<8x128xf32>
    %c102 = arith.constant 102 : index
    %456 = memref.load %arg1[%c102] : memref<141xf32, #tpu.memory_space<smem>>
    %457 = vector.broadcast %456 : f32 to vector<8x128xf32>
    %458 = arith.mulf %457, %21 : vector<8x128xf32>
    %459 = arith.addf %455, %458 : vector<8x128xf32>
    %c103 = arith.constant 103 : index
    %460 = memref.load %arg1[%c103] : memref<141xf32, #tpu.memory_space<smem>>
    %461 = vector.broadcast %460 : f32 to vector<8x128xf32>
    %462 = arith.mulf %461, %28 : vector<8x128xf32>
    %463 = arith.addf %459, %462 : vector<8x128xf32>
    %c104 = arith.constant 104 : index
    %464 = memref.load %arg1[%c104] : memref<141xf32, #tpu.memory_space<smem>>
    %465 = vector.broadcast %464 : f32 to vector<8x128xf32>
    %466 = arith.mulf %465, %35 : vector<8x128xf32>
    %467 = arith.addf %463, %466 : vector<8x128xf32>
    %c105 = arith.constant 105 : index
    %468 = memref.load %arg1[%c105] : memref<141xf32, #tpu.memory_space<smem>>
    %469 = vector.broadcast %468 : f32 to vector<8x128xf32>
    %470 = arith.mulf %469, %42 : vector<8x128xf32>
    %471 = arith.addf %467, %470 : vector<8x128xf32>
    %c106 = arith.constant 106 : index
    %472 = memref.load %arg1[%c106] : memref<141xf32, #tpu.memory_space<smem>>
    %473 = vector.broadcast %472 : f32 to vector<8x128xf32>
    %474 = arith.mulf %473, %49 : vector<8x128xf32>
    %475 = arith.addf %471, %474 : vector<8x128xf32>
    %c107 = arith.constant 107 : index
    %476 = memref.load %arg1[%c107] : memref<141xf32, #tpu.memory_space<smem>>
    %477 = vector.broadcast %476 : f32 to vector<8x128xf32>
    %478 = arith.mulf %477, %56 : vector<8x128xf32>
    %479 = arith.addf %475, %478 : vector<8x128xf32>
    %c108 = arith.constant 108 : index
    %480 = memref.load %arg1[%c108] : memref<141xf32, #tpu.memory_space<smem>>
    %481 = vector.broadcast %480 : f32 to vector<8x128xf32>
    %482 = arith.mulf %481, %63 : vector<8x128xf32>
    %483 = arith.addf %479, %482 : vector<8x128xf32>
    %c109 = arith.constant 109 : index
    %484 = memref.load %arg1[%c109] : memref<141xf32, #tpu.memory_space<smem>>
    %485 = vector.broadcast %484 : f32 to vector<8x128xf32>
    %486 = arith.mulf %485, %70 : vector<8x128xf32>
    %487 = arith.addf %483, %486 : vector<8x128xf32>
    %c128 = arith.constant 128 : index
    %488 = memref.load %arg1[%c128] : memref<141xf32, #tpu.memory_space<smem>>
    %489 = vector.broadcast %488 : f32 to vector<8x128xf32>
    %490 = arith.addf %487, %489 : vector<8x128xf32>
    %491 = math.tanh %490 : vector<8x128xf32>
    %c138 = arith.constant 138 : index
    %492 = memref.load %arg1[%c138] : memref<141xf32, #tpu.memory_space<smem>>
    %493 = vector.broadcast %492 : f32 to vector<8x128xf32>
    %494 = arith.mulf %493, %491 : vector<8x128xf32>
    %495 = arith.addf %448, %494 : vector<8x128xf32>
    %c110 = arith.constant 110 : index
    %496 = memref.load %arg1[%c110] : memref<141xf32, #tpu.memory_space<smem>>
    %497 = vector.broadcast %496 : f32 to vector<8x128xf32>
    %498 = arith.mulf %497, %7 : vector<8x128xf32>
    %c111 = arith.constant 111 : index
    %499 = memref.load %arg1[%c111] : memref<141xf32, #tpu.memory_space<smem>>
    %500 = vector.broadcast %499 : f32 to vector<8x128xf32>
    %501 = arith.mulf %500, %14 : vector<8x128xf32>
    %502 = arith.addf %498, %501 : vector<8x128xf32>
    %c112 = arith.constant 112 : index
    %503 = memref.load %arg1[%c112] : memref<141xf32, #tpu.memory_space<smem>>
    %504 = vector.broadcast %503 : f32 to vector<8x128xf32>
    %505 = arith.mulf %504, %21 : vector<8x128xf32>
    %506 = arith.addf %502, %505 : vector<8x128xf32>
    %c113 = arith.constant 113 : index
    %507 = memref.load %arg1[%c113] : memref<141xf32, #tpu.memory_space<smem>>
    %508 = vector.broadcast %507 : f32 to vector<8x128xf32>
    %509 = arith.mulf %508, %28 : vector<8x128xf32>
    %510 = arith.addf %506, %509 : vector<8x128xf32>
    %c114 = arith.constant 114 : index
    %511 = memref.load %arg1[%c114] : memref<141xf32, #tpu.memory_space<smem>>
    %512 = vector.broadcast %511 : f32 to vector<8x128xf32>
    %513 = arith.mulf %512, %35 : vector<8x128xf32>
    %514 = arith.addf %510, %513 : vector<8x128xf32>
    %c115 = arith.constant 115 : index
    %515 = memref.load %arg1[%c115] : memref<141xf32, #tpu.memory_space<smem>>
    %516 = vector.broadcast %515 : f32 to vector<8x128xf32>
    %517 = arith.mulf %516, %42 : vector<8x128xf32>
    %518 = arith.addf %514, %517 : vector<8x128xf32>
    %c116 = arith.constant 116 : index
    %519 = memref.load %arg1[%c116] : memref<141xf32, #tpu.memory_space<smem>>
    %520 = vector.broadcast %519 : f32 to vector<8x128xf32>
    %521 = arith.mulf %520, %49 : vector<8x128xf32>
    %522 = arith.addf %518, %521 : vector<8x128xf32>
    %c117 = arith.constant 117 : index
    %523 = memref.load %arg1[%c117] : memref<141xf32, #tpu.memory_space<smem>>
    %524 = vector.broadcast %523 : f32 to vector<8x128xf32>
    %525 = arith.mulf %524, %56 : vector<8x128xf32>
    %526 = arith.addf %522, %525 : vector<8x128xf32>
    %c118 = arith.constant 118 : index
    %527 = memref.load %arg1[%c118] : memref<141xf32, #tpu.memory_space<smem>>
    %528 = vector.broadcast %527 : f32 to vector<8x128xf32>
    %529 = arith.mulf %528, %63 : vector<8x128xf32>
    %530 = arith.addf %526, %529 : vector<8x128xf32>
    %c119 = arith.constant 119 : index
    %531 = memref.load %arg1[%c119] : memref<141xf32, #tpu.memory_space<smem>>
    %532 = vector.broadcast %531 : f32 to vector<8x128xf32>
    %533 = arith.mulf %532, %70 : vector<8x128xf32>
    %534 = arith.addf %530, %533 : vector<8x128xf32>
    %c129 = arith.constant 129 : index
    %535 = memref.load %arg1[%c129] : memref<141xf32, #tpu.memory_space<smem>>
    %536 = vector.broadcast %535 : f32 to vector<8x128xf32>
    %537 = arith.addf %534, %536 : vector<8x128xf32>
    %538 = math.tanh %537 : vector<8x128xf32>
    %c139 = arith.constant 139 : index
    %539 = memref.load %arg1[%c139] : memref<141xf32, #tpu.memory_space<smem>>
    %540 = vector.broadcast %539 : f32 to vector<8x128xf32>
    %541 = arith.mulf %540, %538 : vector<8x128xf32>
    %542 = arith.addf %495, %541 : vector<8x128xf32>
    %c0_2 = arith.constant 0 : index
    %c0_3 = arith.constant 0 : index
    %543 = vector.load %arg3[%c0_2, %c0_3] : memref<8x128xf32, #tpu.memory_space<vmem>>, vector<8x128xf32>
    tpu.vector_store %arg3[%c0_2, %c0_3], %542 {strides = array<i32>} : memref<8x128xf32, #tpu.memory_space<vmem>>, vector<8x128xf32>,
    return
  }
  func.func @transform_0(%arg0: i32) -> i32 {
    %c0_i32 = arith.constant 0 : i32
    %c0_i32_0 = arith.constant 0 : i32
    return %c0_i32 : i32
  }
  func.func @transform_1(%arg0: i32) -> (i32, i32) {
    %c0_i32 = arith.constant 0 : i32
    %c0_i32_0 = arith.constant 0 : i32
    return %arg0, %c0_i32 : i32, i32
  }
  func.func @transform_2(%arg0: i32) -> (i32, i32) {
    %c0_i32 = arith.constant 0 : i32
    %c0_i32_0 = arith.constant 0 : i32
    return %arg0, %c0_i32 : i32, i32
  }
}

</mosaic_0001>

<bundles_post_ra>
// kernel: tpu_custom_call.1
= control target key start
LH: loop header
LB: loop body
LE: loop exit
PB: predicated region body
PF: predicated region fallthrough
CT: control target
= control target key end

     0   :  { %s1402_s0 = inlined_call_operand.hbm [shape: f32[141], index: 0, kind: input, shape index: {}]   ;;  %s1403_s1 = inlined_call_operand.hbm [shape: f32[8,128], index: 1, kind: input, shape index: {}]   ;;  %s1404_s2 = inlined_call_operand.hbm [shape: f32[8,128], index: 2, kind: output, shape index: {}]  }
   0x1   :  { %1407 = sst [smem:[#allocation14_spill]] %s1404_s2 }
   0x2   :  { %7 = vsyncpa [#allocation5], 0 }
   0x3   :  { %8 = vsyncpa [#allocation3], 0 }
   0x4   :  { %9 = vsyncpa [#allocation4], 0  ;;  %s832_s9 = smov [#allocation2]   ;;  %s833_s12 = smov [#allocation6]  }
   0x5   :  { %17 = dma.hbm_to_smem %s1402_s0, 32, %s832_s9, [#allocation5]  }
   0x6   :  { %s24_s13 = sshll.u32 %s833_s12, 4  ;;  %s25_s13 = int_to_ptr.vmem [resolvable:$true] %s24_s13 }
   0x7   :  { %s794_s14 = scalar_lea.vmem %s25_s13, 128  ;;  %p799_p1 = scmp.lt.s32.totalorder %s25_s13, %s25_s13 }
   0x8   :  { %p795_p0 = scmp.ne.s32.totalorder %s25_s13, %s794_s14  ;;  %p800_p2 = scmp.lt.s32.totalorder %s794_s14, %s794_s14 }
   0xa   :  { %p801_p3 = por %p800_p2, %p799_p1 }
   0xc   :  { %p802_p4 = pnand %p801_p3, %p795_p0 }
   0xe   :  { %805 = shalt.err (!%p802_p4)
}
   0xf   :  { %27 = dma.hbm_to_vmem [thread:$0]  %s1403_s1, 128, %s25_s13, [#allocation3]  }
  0x10   :  { %826 = dma.done.wait [#allocation5], 32  }
  0x11   :  { %827 = vsyncadd [#allocation5], 4294967264 }
  0x12   :  { %828 = dma.done.wait [#allocation3], 128  }
  0x13   :  { %829 = vsyncadd [#allocation3], 4294967168 }
  0x14   :  { %34 = sfence }
  0x15   :  { %s36_s0 = sld [smem:[#allocation2]]  ;;  %v886_v0 = vld [vmem:[#allocation6] sm:$0xff] }
  0x16   :  { %s856_s17 = sld [smem:[#allocation2 + $0xa]] }
  0x17   :  { %s596_s18 = sld [smem:[#allocation2 + $0x1]] }
  0x18   :  { %s858_s19 = sld [smem:[#allocation2 + $0xb]] }
  0x19   :  { %s860_s20 = sld [smem:[#allocation2 + $0x2]] }
  0x1a   :  { %s862_s21 = sld [smem:[#allocation2 + $0xc]] }
  0x1b   :  { %s864_s22 = sld [smem:[#allocation2 + $0x3]]  ;;  %v37_v1 = vstv %s36_s0 }
  0x1c   :  { %s866_s23 = sld [smem:[#allocation2 + $0xd]]  ;;  %v38_v3 = vmul.f32 %v37_v1, %v886_v0  ;;  %v40_v4 = vstv %s856_s17 }
  0x1d   :  { %s868_s1 = sld [smem:[#allocation2 + $0x4]]  ;;  %v44_v2 = vstv %s596_s18 }
  0x1e   :  { %s870_s24 = sld [smem:[#allocation2 + $0xe]]  ;;  %v45_v5 = vmul.f32 %v44_v2, %v886_v0  ;;  %v47_v6 = vstv %s858_s19  ;;  %v41_v8 = vadd.f32 %v40_v4, %v38_v3 }
  0x1f   :  { %s872_s25 = sld [smem:[#allocation2 + $0x5]]  ;;  %v51_v7 = vstv %s860_s20 }
  0x20   :  { %s874_s26 = sld [smem:[#allocation2 + $0xf]]  ;;  %v48_v9 = vadd.f32 %v47_v6, %v45_v5  ;;  %v52_v10 = vmul.f32 %v51_v7, %v886_v0  ;;  %v54_v11 = vstv %s862_s21  ;;  %738 = vtanh.f32 %v41_v8 }
  0x21   :  { %s876_s27 = sld [smem:[#allocation2 + $0x6]]  ;;  %v58_v12 = vstv %s864_s22 }
  0x22   :  { %s878_s28 = sld [smem:[#allocation2 + $0x10]]  ;;  %740 = vtanh.f32 %v48_v9  ;;  %v55_v13 = vadd.f32 %v54_v11, %v52_v10  ;;  %v59_v14 = vmul.f32 %v58_v12, %v886_v0  ;;  %v61_v15 = vstv %s866_s23 }
  0x23   :  { %s880_s29 = sld [smem:[#allocation2 + $0x7]]  ;;  %v65_v16 = vstv %s868_s1 }
  0x24   :  { %s882_s30 = sld [smem:[#allocation2 + $0x11]]  ;;  %742 = vtanh.f32 %v55_v13  ;;  %v62_v17 = vadd.f32 %v61_v15, %v59_v14  ;;  %v66_v18 = vmul.f32 %v65_v16, %v886_v0  ;;  %v68_v19 = vstv %s870_s24 }
  0x25   :  { %s884_s3 = sld [smem:[#allocation2 + $0x8]]  ;;  %v72_v20 = vstv %s872_s25 }
  0x26   :  { %s888_s4 = sld [smem:[#allocation2 + $0x12]]  ;;  %744 = vtanh.f32 %v62_v17  ;;  %v69_v21 = vadd.f32 %v68_v19, %v66_v18  ;;  %v73_v22 = vmul.f32 %v72_v20, %v886_v0  ;;  %v75_v24 = vstv %s874_s26 }
  0x27   :  { %s890_s5 = sld [smem:[#allocation2 + $0x9]]  ;;  %v79_v23 = vstv %s876_s27 }
  0x28   :  { %s892_s6 = sld [smem:[#allocation2 + $0x13]]  ;;  %v80_v25 = vmul.f32 %v79_v23, %v886_v0  ;;  %746 = vtanh.f32 %v69_v21  ;;  %v76_v27 = vadd.f32 %v75_v24, %v73_v22  ;;  %v82_v28 = vstv %s878_s28 }
  0x29   :  { %s895_s7 = sld [smem:[#allocation2 + $0x8c]]  ;;  %v86_v29 = vstv %s880_s29 }
  0x2a   :  { %s899_s8 = sld [smem:[#allocation2 + $0x14]]  ;;  %v83_v33 = vadd.f32 %v82_v28, %v80_v25  ;;  %v87_v34 = vmul.f32 %v86_v29, %v886_v0  ;;  %748 = vtanh.f32 %v76_v27  ;;  %v89_v35 = vstv %s882_s30 }
  0x2b   :  { %s903_s9 = sld [smem:[#allocation2 + $0x15]]  ;;  %v93_v39 = vstv %s884_s3 }
  0x2c   :  { %s905_s10 = sld [smem:[#allocation2 + $0x16]]  ;;  %750 = vtanh.f32 %v83_v33  ;;  %v90_v41 = vadd.f32 %v89_v35, %v87_v34  ;;  %v94_v42 = vmul.f32 %v93_v39, %v886_v0  ;;  %v96_v47 = vstv %s888_s4 }
  0x2d   :  { %s907_s11 = sld [smem:[#allocation2 + $0x17]]  ;;  %v954_v26 = vpop.eup %738  ;;  %v100_v43 = vstv %s890_s5 }
  0x2e   :  { %s910_s12 = sld [smem:[#allocation2 + $0x18]]  ;;  %752 = vtanh.f32 %v90_v41  ;;  %v101_v49 = vmul.f32 %v100_v43, %v886_v0  ;;  %v97_v52 = vadd.f32 %v96_v47, %v94_v42  ;;  %v103_v53 = vstv %s892_s6 }
  0x2f   :  { %s914_s13 = sld [smem:[#allocation2 + $0x19]]  ;;  %v960_v30 = vpop.eup %740 }
  0x30   :  { %s916_s14 = sld [smem:[#allocation2 + $0x1a]]  ;;  %v109_v31 = vstv %s899_s8  ;;  %v104_v60 = vadd.f32 %v103_v53, %v101_v49  ;;  %754 = vtanh.f32 %v97_v52 }
  0x31   :  { %s918_s15 = sld [smem:[#allocation2 + $0x1b]]  ;;  %v112_v32 = vstv %s903_s9  ;;  %v110_v36 = vmul.f32 %v954_v26, %v109_v31  ;;  %v976_v38 = vpop.eup %742 }
  0x32   :  { %s921_s16 = sld [smem:[#allocation2 + $0x1c]]  ;;  %v113_v37 = vmul.f32 %v960_v30, %v112_v32  ;;  %v116_v40 = vstv %s905_s10  ;;  %756 = vtanh.f32 %v104_v60 }
  0x33   :  { %s925_s0 = sld [smem:[#allocation2 + $0x1d]]  ;;  %v117_v45 = vmul.f32 %v976_v38, %v116_v40  ;;  %v991_v46 = vpop.eup %744  ;;  %v120_v48 = vstv %s907_s11 }
  0x34   :  { %s927_s17 = sld [smem:[#allocation2 + $0x78]]  ;;  %v114_v44 = vadd.f32 %v113_v37, %v110_v36  ;;  %v121_v55 = vmul.f32 %v991_v46, %v120_v48  ;;  %v124_v57 = vstv %s910_s12 }
  0x35   :  { %s929_s18 = sld [smem:[#allocation2 + $0x82]]  ;;  %v1008_v56 = vpop.eup %746  ;;  %v128_v1 = vstv %s914_s13 }
  0x36   :  { %s932_s19 = sld [smem:[#allocation2 + $0x1e]]  ;;  %v118_v54 = vadd.f32 %v117_v45, %v114_v44  ;;  %v125_v63 = vmul.f32 %v1008_v56, %v124_v57  ;;  %v132_v10 = vstv %s916_s14 }
  0x37   :  { %s936_s20 = sld [smem:[#allocation2 + $0x1f]]  ;;  %v1023_v0 = vpop.eup %748  ;;  %v136_v20 = vstv %s918_s15 }
  0x38   :  { %s938_s21 = sld [smem:[#allocation2 + $0x20]]  ;;  %v122_v62 = vadd.f32 %v121_v55, %v118_v54  ;;  %v129_v7 = vmul.f32 %v1023_v0, %v128_v1  ;;  %v140_v34 = vstv %s921_s16 }
  0x39   :  { %s940_s22 = sld [smem:[#allocation2 + $0x21]]  ;;  %v1034_v5 = vpop.eup %750  ;;  %v144_v49 = vstv %s925_s0 }
  0x3a   :  { %s944_s23 = sld [smem:[#allocation2 + $0x22]]  ;;  %v126_v6 = vadd.f32 %v125_v63, %v122_v62  ;;  %v133_v18 = vmul.f32 %v1034_v5, %v132_v10  ;;  %v148_v10 = vstv %s927_s17 }
  0x3b   :  { %1408 = sst [smem:[#allocation11_spill]] %s929_s18  ;;  %v1052_v16 = vpop.eup %752 }
  0x3c   :  { %s947_s1 = sld [smem:[#allocation2 + $0x23]]  ;;  %v156_v50 = vstv %s932_s19  ;;  %v130_v17 = vadd.f32 %v129_v7, %v126_v6  ;;  %v137_v31 = vmul.f32 %v1052_v16, %v136_v20 }
  0x3d   :  { %s949_s24 = sld [smem:[#allocation2 + $0x24]]  ;;  %v159_v51 = vstv %s936_s20  ;;  %v157_v58 = vmul.f32 %v954_v26, %v156_v50  ;;  %v1074_v33 = vpop.eup %754 }
  0x3e   :  { %s952_s25 = sld [smem:[#allocation2 + $0x25]]  ;;  %v160_v59 = vmul.f32 %v960_v30, %v159_v51  ;;  %v163_v61 = vstv %s938_s21  ;;  %v134_v29 = vadd.f32 %v133_v18, %v130_v17  ;;  %v141_v47 = vmul.f32 %v1074_v33, %v140_v34 }
  0x3f   :  { %s958_s27 = sld [smem:[#allocation2 + $0x26]]  ;;  %v164_v3 = vmul.f32 %v976_v38, %v163_v61  ;;  %v167_v4 = vstv %s940_s22  ;;  %v1089_v44 = vpop.eup %756 }
  0x40   :  { %s964_s26 = sld [smem:[#allocation2 + $0x27]]  ;;  %v161_v2 = vadd.f32 %v160_v59, %v157_v58  ;;  %v168_v12 = vmul.f32 %v991_v46, %v167_v4  ;;  %v171_v13 = vstv %s944_s23  ;;  %v138_v45 = vadd.f32 %v137_v31, %v134_v29 }
  0x41   :  { %s966_s2 = sld [smem:[#allocation2 + $0x79]]  ;;  %v172_v22 = vmul.f32 %v1008_v56, %v171_v13  ;;  %v145_v60 = vmul.f32 %v1089_v44, %v144_v49 }
  0x42   :  { %s969_s18 = sld [smem:[#allocation2 + $0x83]]  ;;  %v165_v11 = vadd.f32 %v164_v3, %v161_v2  ;;  %v175_v25 = vstv %s947_s1  ;;  %v142_v59 = vadd.f32 %v141_v47, %v138_v45 }
  0x43   :  { %s974_s28 = sld [smem:[#allocation2 + $0x28]]  ;;  %v176_v39 = vmul.f32 %v1023_v0, %v175_v25  ;;  %v179_v41 = vstv %s949_s24 }
  0x44   :  { %s980_s29 = sld [smem:[#allocation2 + $0x29]]  ;;  %v169_v21 = vadd.f32 %v168_v12, %v165_v11  ;;  %v180_v53 = vmul.f32 %v1034_v5, %v179_v41  ;;  %v183_v55 = vstv %s952_s25 }
  0x45   :  { %s982_s8 = sld [smem:[#allocation2 + $0x2a]]  ;;  %v184_v4 = vmul.f32 %v1052_v16, %v183_v55  ;;  %v187_v7 = vstv %s958_s27 }
  0x46   :  { %s984_s30 = sld [smem:[#allocation2 + $0x2b]]  ;;  %v173_v37 = vadd.f32 %v172_v22, %v169_v21  ;;  %v188_v20 = vmul.f32 %v1074_v33, %v187_v7  ;;  %v191_v21 = vstv %s964_s26 }
  0x47   :  { %s989_s9 = sld [smem:[#allocation2 + $0x2c]] }
  0x48   :  { %1409 = sst [smem:[#allocation12_spill]] %s969_s18  ;;  %v177_v52 = vadd.f32 %v176_v39, %v173_v37  ;;  %v192_v39 = vmul.f32 %v1089_v44, %v191_v21 }
  0x49   :  { %s995_s3 = sld [smem:[#allocation2 + $0x2d]]  ;;  %v203_v8 = vstv %s974_s28 }
  0x4a   :  { %s997_s10 = sld [smem:[#allocation2 + $0x2e]]  ;;  %v206_v9 = vstv %s980_s29  ;;  %v204_v14 = vmul.f32 %v954_v26, %v203_v8  ;;  %v181_v3 = vadd.f32 %v180_v53, %v177_v52 }
  0x4b   :  { %s1002_s5 = sld [smem:[#allocation2 + $0x2f]]  ;;  %v207_v15 = vmul.f32 %v960_v30, %v206_v9  ;;  %v210_v19 = vstv %s982_s8 }
  0x4c   :  { %s1006_s4 = sld [smem:[#allocation2 + $0x30]]  ;;  %v211_v28 = vmul.f32 %v976_v38, %v210_v19  ;;  %v214_v32 = vstv %s984_s30  ;;  %v185_v19 = vadd.f32 %v184_v4, %v181_v3 }
  0x4d   :  { %s1011_s11 = sld [smem:[#allocation2 + $0x31]]  ;;  %v208_v27 = vadd.f32 %v207_v15, %v204_v14  ;;  %v215_v43 = vmul.f32 %v991_v46, %v214_v32  ;;  %v218_v48 = vstv %s989_s9  ;;  %v146_v14 = vadd.f32 %v145_v60, %v142_v59 }
  0x4e   :  { %s1015_s19 = sld [smem:[#allocation2 + $0x7a]]  ;;  %v219_v58 = vmul.f32 %v1008_v56, %v218_v48 }
  0x4f   :  { %s1018_s6 = sld [smem:[#allocation2 + $0x84]]  ;;  %v212_v42 = vadd.f32 %v211_v28, %v208_v27  ;;  %v222_v61 = vstv %s995_s3  ;;  %v107_v28 = vstv %s895_s7  ;;  %v149_v34 = vadd.f32 %v148_v10, %v146_v14 }
  0x50   :  { %s1021_s12 = sld [smem:[#allocation2 + $0x32]]  ;;  %v223_v9 = vmul.f32 %v1023_v0, %v222_v61  ;;  %v226_v11 = vstv %s997_s10 }
  0x51   :  { %s1026_s20 = sld [smem:[#allocation2 + $0x33]]  ;;  %v216_v57 = vadd.f32 %v215_v43, %v212_v42  ;;  %v230_v29 = vstv %s1002_s5  ;;  %v189_v43 = vadd.f32 %v188_v20, %v185_v19  ;;  %758 = vtanh.f32 %v149_v34 }
  0x52   :  { %s1029_s21 = sld [smem:[#allocation2 + $0x34]]  ;;  %v231_v47 = vmul.f32 %v1052_v16, %v230_v29  ;;  %v234_v49 = vstv %s1006_s4 }
  0x53   :  { %s1039_s13 = sld [smem:[#allocation2 + $0x36]]  ;;  %v220_v8 = vadd.f32 %v219_v58, %v216_v57  ;;  %v195_v58 = vstv %s966_s2  ;;  %v193_v61 = vadd.f32 %v192_v39, %v189_v43 }
  0x54   :  { %s1042_s18 = sld [smem:[#allocation2 + $0x37]] }
  0x55   :  { %1410 = sst [smem:[#allocation13_spill]] %s1018_s6 }
  0x56   :  { %s1032_s6 = sld [smem:[#allocation2 + $0x35]]  ;;  %v250_v23 = vstv %s1021_s12 }
  0x57   :  { %s1045_s22 = sld [smem:[#allocation2 + $0x38]]  ;;  %v253_v24 = vstv %s1026_s20  ;;  %v251_v35 = vmul.f32 %v954_v26, %v250_v23  ;;  %v224_v23 = vadd.f32 %v223_v9, %v220_v8 }
  0x58   :  { %s1050_s28 = sld [smem:[#allocation2 + $0x39]]  ;;  %v254_v36 = vmul.f32 %v960_v30, %v253_v24  ;;  %v257_v40 = vstv %s1029_s21  ;;  %v227_v24 = vmul.f32 %v1034_v5, %v226_v11 }
  0x59   :  { %s1056_s14 = sld [smem:[#allocation2 + $0x3a]]  ;;  %v258_v51 = vmul.f32 %v976_v38, %v257_v40  ;;  %v265_v6 = vstv %s1039_s13 }
  0x5a   :  { %s1059_s29 = sld [smem:[#allocation2 + $0x3b]]  ;;  %v255_v50 = vadd.f32 %v254_v36, %v251_v35  ;;  %v266_v17 = vmul.f32 %v1008_v56, %v265_v6  ;;  %v269_v22 = vstv %s1042_s18  ;;  %v228_v45 = vadd.f32 %v227_v24, %v224_v23 }
  0x5b   :  { %s1064_s23 = sld [smem:[#allocation2 + $0x7b]]  ;;  %v270_v36 = vmul.f32 %v1023_v0, %v269_v22 }
  0x5c   :  { %s1068_s8 = sld [smem:[#allocation2 + $0x85]]  ;;  %v261_v54 = vstv %s1032_s6  ;;  %v259_v62 = vadd.f32 %v258_v51, %v255_v50  ;;  %v238_v50 = vstv %s1011_s11 }
  0x5d   :  { %s1072_s15 = sld [smem:[#allocation2 + $0x3c]]  ;;  %v262_v63 = vmul.f32 %v991_v46, %v261_v54  ;;  %v273_v40 = vstv %s1045_s22 }
  0x5e   :  { %s1079_s1 = sld [smem:[#allocation2 + $0x3d]]  ;;  %v274_v54 = vmul.f32 %v1034_v5, %v273_v40  ;;  %v277_v55 = vstv %s1050_s28 }
  0x5f   :  { %s1083_s12 = sld [smem:[#allocation2 + $0x3e]]  ;;  %v263_v15 = vadd.f32 %v262_v63, %v259_v62  ;;  %v232_v62 = vadd.f32 %v231_v47, %v228_v45  ;;  %v235_v63 = vmul.f32 %v1074_v33, %v234_v49  ;;  %v278_v3 = vmul.f32 %v1052_v16, %v277_v55  ;;  %v759_v55 = vpop.eup %758 }
  0x60   :  { %s1087_s16 = sld [smem:[#allocation2 + $0x3f]]  ;;  %v281_v8 = vstv %s1056_s14  ;;  %v242_v47 = vstv %s1015_s19 }
  0x61   :  { %s1093_s30 = sld [smem:[#allocation2 + $0x40]]  ;;  %v267_v35 = vadd.f32 %v266_v17, %v263_v15  ;;  %v236_v15 = vadd.f32 %v235_v63, %v232_v62 }
  0x62   :  { %s1097_s24 = sld [smem:[#allocation2 + $0x41]] }
  0x63   :  { %s1101_s20 = sld [smem:[#allocation2 + $0x42]]  ;;  %v297_v1 = vstv %s1072_s15  ;;  %v271_v53 = vadd.f32 %v270_v36, %v267_v35  ;;  %v196_v36 = vadd.f32 %v195_v58, %v193_v61 }
  0x64   :  { %s1105_s0 = sld [smem:[#allocation2 + $0x46]]  ;;  %v300_v2 = vstv %s1079_s1  ;;  %v298_v12 = vmul.f32 %v954_v26, %v297_v1 }
  0x65   :  { %s1109_s9 = sld [smem:[#allocation2 + $0x47]]  ;;  %v301_v13 = vmul.f32 %v960_v30, %v300_v2  ;;  %v304_v18 = vstv %s1083_s12  ;;  %v239_v2 = vmul.f32 %v1089_v44, %v238_v50  ;;  %v275_v7 = vadd.f32 %v274_v54, %v271_v53 }
  0x66   :  { %s1114_s25 = sld [smem:[#allocation2 + $0x43]]  ;;  %v305_v32 = vmul.f32 %v976_v38, %v304_v18  ;;  %v308_v37 = vstv %s1087_s16  ;;  %760 = vtanh.f32 %v196_v36  ;;  %v289_v36 = vstv %s1064_s23 }
  0x67   :  { %s1118_s6 = sld [smem:[#allocation2 + $0x44]]  ;;  %v302_v31 = vadd.f32 %v301_v13, %v298_v12  ;;  %v309_v52 = vmul.f32 %v991_v46, %v308_v37  ;;  %v312_v57 = vstv %s1093_s30  ;;  %v279_v24 = vadd.f32 %v278_v3, %v275_v7 }
  0x68   :  { %s1122_s3 = sld [smem:[#allocation2 + $0x48]]  ;;  %v313_v6 = vmul.f32 %v1008_v56, %v312_v57  ;;  %v316_v9 = vstv %s1097_s24 }
  0x69   :  { %s1128_s21 = sld [smem:[#allocation2 + $0x45]]  ;;  %v306_v51 = vadd.f32 %v305_v32, %v302_v31  ;;  %v317_v21 = vmul.f32 %v1023_v0, %v316_v9  ;;  %v285_v32 = vstv %s1059_s29 }
  0x6a   :  { %s1132_s27 = sld [smem:[#allocation2 + $0x7c]]  ;;  %v344_v25 = vstv %s1105_s0  ;;  %v286_v49 = vmul.f32 %v1089_v44, %v285_v32 }
  0x6b   :  { %s1137_s17 = sld [smem:[#allocation2 + $0x49]]  ;;  %v347_v27 = vstv %s1109_s9  ;;  %v345_v41 = vmul.f32 %v954_v26, %v344_v25  ;;  %v310_v4 = vadd.f32 %v309_v52, %v306_v51  ;;  %v282_v25 = vmul.f32 %v1074_v33, %v281_v8 }
  0x6c   :  { %s1142_s10 = sld [smem:[#allocation2 + $0x4a]]  ;;  %v348_v42 = vmul.f32 %v960_v30, %v347_v27  ;;  %v320_v27 = vstv %s1101_s20  ;;  %v324_v50 = vstv %s1114_s25 }
  0x6d   :  { %s1147_s13 = sld [smem:[#allocation2 + $0x4b]]  ;;  %v314_v20 = vadd.f32 %v313_v6, %v310_v4  ;;  %v321_v43 = vmul.f32 %v1034_v5, %v320_v27  ;;  %v328_v52 = vstv %s1118_s6  ;;  %v325_v62 = vmul.f32 %v1052_v16, %v324_v50 }
  0x6e   :  { %s1151_s18 = sld [smem:[#allocation2 + $0x4c]]  ;;  %v351_v48 = vstv %s1122_s3  ;;  %v349_v59 = vadd.f32 %v348_v42, %v345_v41  ;;  %v240_v41 = vadd.f32 %v239_v2, %v236_v15  ;;  %v329_v2 = vmul.f32 %v1074_v33, %v328_v52 }
  0x6f   :  { %s1157_s26 = sld [smem:[#allocation2 + $0x4d]]  ;;  %v352_v60 = vmul.f32 %v976_v38, %v351_v48  ;;  %v318_v42 = vadd.f32 %v317_v21, %v314_v20  ;;  %v283_v48 = vadd.f32 %v282_v25, %v279_v24 }
  0x70   :  { %s1161_s5 = sld [smem:[#allocation2 + $0x50]] }
  0x71   :  { %s1166_s22 = sld [smem:[#allocation2 + $0x51]]  ;;  %v355_v1 = vstv %s1137_s17  ;;  %v353_v11 = vadd.f32 %v352_v60, %v349_v59  ;;  %v243_v60 = vadd.f32 %v242_v47, %v240_v41  ;;  %v322_v61 = vadd.f32 %v321_v43, %v318_v42 }
  0x72   :  { %s1171_s15 = sld [smem:[#allocation2 + $0x52]]  ;;  %v356_v12 = vmul.f32 %v991_v46, %v355_v1  ;;  %v359_v17 = vstv %s1142_s10  ;;  %v287_v1 = vadd.f32 %v286_v49, %v283_v48 }
  0x73   :  { %s1175_s4 = sld [smem:[#allocation2 + $0x53]]  ;;  %v360_v35 = vmul.f32 %v1008_v56, %v359_v17  ;;  %v363_v37 = vstv %s1147_s13  ;;  %762 = vtanh.f32 %v243_v60 }
  0x74   :  { %s1179_s11 = sld [smem:[#allocation2 + $0x4e]]  ;;  %v357_v34 = vadd.f32 %v356_v12, %v353_v11  ;;  %v364_v54 = vmul.f32 %v1023_v0, %v363_v37  ;;  %v367_v57 = vstv %s1151_s18  ;;  %v290_v50 = vadd.f32 %v289_v36, %v287_v1 }
  0x75   :  { %s1184_s2 = sld [smem:[#allocation2 + $0x54]]  ;;  %v371_v3 = vstv %s1157_s26  ;;  %v368_v7 = vmul.f32 %v1034_v5, %v367_v57  ;;  %v336_v57 = vstv %s1132_s27 }
  0x76   :  { %s1188_s28 = sld [smem:[#allocation2 + $0x4f]]  ;;  %v391_v10 = vstv %s1161_s5  ;;  %v361_v53 = vadd.f32 %v360_v35, %v357_v34  ;;  %v372_v20 = vmul.f32 %v1052_v16, %v371_v3  ;;  %764 = vtanh.f32 %v290_v50 }
  0x77   :  { %s1192_s1 = sld [smem:[#allocation2 + $0x7d]]  ;;  %v392_v13 = vmul.f32 %v954_v26, %v391_v10  ;;  %v394_v14 = vstv %s1166_s22 }
  0x78   :  { %s1411_s12 = sld [smem:[#allocation11_spill]]  ;;  %v395_v18 = vmul.f32 %v960_v30, %v394_v14  ;;  %v398_v19 = vstv %s1171_s15  ;;  %v365_v6 = vadd.f32 %v364_v54, %v361_v53  ;;  %v326_v14 = vadd.f32 %v325_v62, %v322_v61  ;;  %v761_v54 = vpop.eup %760 }
  0x79   :  { %s1199_s14 = sld [smem:[#allocation2 + $0x55]]  ;;  %v399_v22 = vmul.f32 %v976_v38, %v398_v19  ;;  %v402_v23 = vstv %s1175_s4  ;;  %v332_v19 = vstv %s1128_s21 }
  0x7a   :  { %s1204_s16 = sld [smem:[#allocation2 + $0x56]]  ;;  %v396_v29 = vadd.f32 %v395_v18, %v392_v13  ;;  %v403_v40 = vmul.f32 %v991_v46, %v402_v23  ;;  %v369_v23 = vadd.f32 %v368_v7, %v365_v6  ;;  %v375_v24 = vstv %s1179_s11 }
  0x7b   :  { %s1208_s30 = sld [smem:[#allocation2 + $0x57]]  ;;  %v406_v45 = vstv %s1184_s2  ;;  %v330_v37 = vadd.f32 %v329_v2, %v326_v14  ;;  %v376_v48 = vmul.f32 %v1074_v33, %v375_v24 }
  0x7c   :  { %s1213_s24 = sld [smem:[#allocation2 + $0x58]]  ;;  %v400_v39 = vadd.f32 %v399_v22, %v396_v29  ;;  %v407_v59 = vmul.f32 %v1008_v56, %v406_v45  ;;  %v373_v47 = vadd.f32 %v372_v20, %v369_v23  ;;  %v379_v49 = vstv %s1188_s28 }
  0x7d   :  { %s1412_s0 = sld [smem:[#allocation12_spill]]  ;;  %v380_v60 = vmul.f32 %v1089_v44, %v379_v49 }
  0x7e   :  { %v152_v31 = vstv %s1411_s12  ;;  %s1217_s20 = sld [smem:[#allocation2 + $0x5a]]  ;;  %v404_v58 = vadd.f32 %v403_v40, %v400_v39  ;;  %v333_v39 = vmul.f32 %v1089_v44, %v332_v19  ;;  %v377_v1 = vadd.f32 %v376_v48, %v373_v47 }
  0x7f   :  { %s1221_s29 = sld [smem:[#allocation2 + $0x5b]]  ;;  %v410_v63 = vstv %s1199_s14  ;;  %v1282_v41 = vmul.f32 %v759_v55, %v152_v31 }
  0x80   :  { %s1226_s9 = sld [smem:[#allocation2 + $0x5c]]  ;;  %v408_v10 = vadd.f32 %v407_v59, %v404_v58  ;;  %v411_v11 = vmul.f32 %v1023_v0, %v410_v63  ;;  %v414_v15 = vstv %s1204_s16  ;;  %v334_v55 = vadd.f32 %v333_v39, %v330_v37 }
  0x81   :  { %s1231_s3 = sld [smem:[#allocation2 + $0x5d]]  ;;  %v415_v32 = vmul.f32 %v1034_v5, %v414_v15  ;;  %v418_v40 = vstv %s1208_s30  ;;  %v381_v19 = vadd.f32 %v380_v60, %v377_v1  ;;  %v154_v39 = vadd.f32 %v1282_v41, %v107_v28 }
  0x82   :  { %s1235_s19 = sld [smem:[#allocation2 + $0x5e]]  ;;  %v412_v29 = vadd.f32 %v411_v11, %v408_v10  ;;  %v419_v52 = vmul.f32 %v1052_v16, %v418_v40  ;;  %v422_v58 = vstv %s1213_s24 }
  0x83   :  { %v199_v51 = vstv %s1412_s0  ;;  %s1239_s25 = sld [smem:[#allocation2 + $0x5f]]  ;;  %v423_v7 = vmul.f32 %v1074_v33, %v422_v58 }
  0x84   :  { %v438_v4 = vstv %s1217_s20  ;;  %s1244_s6 = sld [smem:[#allocation2 + $0x60]]  ;;  %v416_v31 = vadd.f32 %v415_v32, %v412_v29  ;;  %v200_v47 = vmul.f32 %v761_v54, %v199_v51 }
  0x85   :  { %s1247_s17 = sld [smem:[#allocation2 + $0x59]]  ;;  %v439_v8 = vmul.f32 %v954_v26, %v438_v4  ;;  %v441_v9 = vstv %s1221_s29 }
  0x86   :  { %s1252_s10 = sld [smem:[#allocation2 + $0x7e]]  ;;  %v442_v12 = vmul.f32 %v960_v30, %v441_v9  ;;  %v445_v13 = vstv %s1226_s9  ;;  %v420_v6 = vadd.f32 %v419_v52, %v416_v31 }
  0x87   :  { %v446_v17 = vmul.f32 %v976_v38, %v445_v13  ;;  %v449_v18 = vstv %s1231_s3  ;;  %s1259_s13 = sld [smem:[#allocation2 + $0x61]] }
  0x88   :  { %v443_v21 = vadd.f32 %v442_v12, %v439_v8  ;;  %v450_v22 = vmul.f32 %v991_v46, %v449_v18  ;;  %s1264_s18 = sld [smem:[#allocation2 + $0x62]]  ;;  %v453_v25 = vstv %s1235_s19  ;;  %v337_v18 = vadd.f32 %v336_v57, %v334_v55 }
  0x89   :  { %v457_v27 = vstv %s1239_s25  ;;  %s1269_s26 = sld [smem:[#allocation2 + $0x63]]  ;;  %v454_v35 = vmul.f32 %v1008_v56, %v453_v25 }
  0x8a   :  { %v447_v34 = vadd.f32 %v446_v17, %v443_v21  ;;  %s1273_s21 = sld [smem:[#allocation2 + $0x64]]  ;;  %v458_v43 = vmul.f32 %v1023_v0, %v457_v27  ;;  %v461_v45 = vstv %s1244_s6  ;;  %v424_v27 = vadd.f32 %v423_v7, %v420_v6 }
  0x8b   :  { %s1278_s5 = sld [smem:[#allocation2 + $0x65]]  ;;  %v462_v59 = vmul.f32 %v1034_v5, %v461_v45  ;;  %v426_v2 = vstv %s1247_s17  ;;  %v763_v45 = vpop.eup %762  ;;  %766 = vtanh.f32 %v337_v18 }
  0x8c   :  { %v451_v42 = vadd.f32 %v450_v22, %v447_v34  ;;  %s1286_s22 = sld [smem:[#allocation2 + $0x66]]  ;;  %v383_v22 = vstv %s1192_s1  ;;  %v427_v23 = vmul.f32 %v1089_v44, %v426_v2  ;;  %v430_v52 = vstv %s1252_s10 }
  0x8d   :  { %s1290_s23 = sld [smem:[#allocation2 + $0x67]]  ;;  %v465_v62 = vstv %s1259_s13 }
  0x8e   :  { %v455_v53 = vadd.f32 %v454_v35, %v451_v42  ;;  %s1293_s15 = sld [smem:[#allocation2 + $0x68]]  ;;  %v466_v11 = vmul.f32 %v1052_v16, %v465_v62  ;;  %v469_v14 = vstv %s1264_s18  ;;  %v384_v42 = vadd.f32 %v383_v22, %v381_v19 }
  0x8f   :  { %s1298_s4 = sld [smem:[#allocation2 + $0x69]]  ;;  %v470_v32 = vmul.f32 %v1074_v33, %v469_v14  ;;  %v473_v35 = vstv %s1269_s26  ;;  %v428_v50 = vadd.f32 %v427_v23, %v424_v27  ;;  %v201_v14 = vadd.f32 %v200_v47, %v154_v39  ;;  %s834_s26 = smov [#allocation7]  }
  0x90   :  { %v459_v61 = vadd.f32 %v458_v43, %v455_v53  ;;  %v485_v63 = vstv %s1273_s21  ;;  %s1303_s11 = sld [smem:[#allocation2 + $0x6a]]  ;;  %v474_v41 = vmul.f32 %v1089_v44, %v473_v35  ;;  %768 = vtanh.f32 %v384_v42  ;;  %s585_s21 = sshll.u32 %s834_s26, 4  ;;  %s586_s21 = int_to_ptr.vmem [resolvable:$true] %s585_s21 }
  0x91   :  { %v486_v3 = vmul.f32 %v954_v26, %v485_v63  ;;  %v488_v4 = vstv %s1278_s5  ;;  %s1308_s27 = sld [smem:[#allocation2 + $0x6b]]  ;;  %v431_v63 = vadd.f32 %v430_v52, %v428_v50  ;;  %s806_s5 = scalar_lea.vmem %s586_s21, 128 }
  0x92   :  { %s1311_s2 = sld [smem:[#allocation2 + $0x7f]]  ;;  %v489_v8 = vmul.f32 %v960_v30, %v488_v4  ;;  %v492_v9 = vstv %s1286_s22  ;;  %v463_v10 = vadd.f32 %v462_v59, %v459_v61  ;;  %p807_p5 = scmp.ne.s32.totalorder %s586_s21, %s806_s5 }
  0x93   :  { %v493_v12 = vmul.f32 %v976_v38, %v492_v9  ;;  %v496_v13 = vstv %s1290_s23  ;;  %s1318_s28 = sld [smem:[#allocation2 + $0x6c]]  ;;  %770 = vtanh.f32 %v431_v63  ;;  %p811_p6 = scmp.lt.s32.totalorder %s586_s21, %s586_s21 }
  0x94   :  { %v490_v15 = vadd.f32 %v489_v8, %v486_v3  ;;  %v497_v17 = vmul.f32 %v991_v46, %v496_v13  ;;  %s1322_s12 = sld [smem:[#allocation2 + $0x6d]]  ;;  %v500_v20 = vstv %s1293_s15  ;;  %v467_v29 = vadd.f32 %v466_v11, %v463_v10  ;;  %v765_v8 = vpop.eup %764  ;;  %p812_p7 = scmp.lt.s32.totalorder %s806_s5, %s806_s5 }
  0x95   :  { %v504_v21 = vstv %s1298_s4  ;;  %s1326_s14 = sld [smem:[#allocation2 + $0x80]]  ;;  %v501_v25 = vmul.f32 %v1008_v56, %v500_v20 }
  0x96   :  { %s1413_s16 = sld [smem:[#allocation13_spill]]  ;;  %v494_v24 = vadd.f32 %v493_v12, %v490_v15  ;;  %v508_v34 = vstv %s1303_s11  ;;  %v505_v37 = vmul.f32 %v1023_v0, %v504_v21  ;;  %v471_v28 = vadd.f32 %v470_v32, %v467_v29  ;;  %p813_p8 = por %p812_p7, %p811_p6 }
  0x97   :  { %s1331_s30 = sld [smem:[#allocation2 + $0x6e]]  ;;  %v512_v43 = vstv %s1308_s27  ;;  %v509_v49 = vmul.f32 %v1034_v5, %v508_v34 }
  0x98   :  { %s1335_s24 = sld [smem:[#allocation2 + $0x6f]]  ;;  %v498_v36 = vadd.f32 %v497_v17, %v494_v24  ;;  %v513_v51 = vmul.f32 %v1052_v16, %v512_v43  ;;  %v475_v1 = vadd.f32 %v474_v41, %v471_v28  ;;  %p814_p9 = pnand %p813_p8, %p807_p5 }
  0x99   :  { %s1339_s1 = sld [smem:[#allocation2 + $0x70]]  ;;  %v516_v31 = vstv %s1318_s28 }
  0x9a   :  { %s1346_s20 = sld [smem:[#allocation2 + $0x71]]  ;;  %v502_v48 = vadd.f32 %v501_v25, %v498_v36  ;;  %v520_v55 = vstv %s1322_s12  ;;  %v517_v60 = vmul.f32 %v1074_v33, %v516_v31 }
  0x9b   :  { %s1351_s29 = sld [smem:[#allocation2 + $0x72]]  ;;  %v521_v4 = vmul.f32 %v1089_v44, %v520_v55  ;;  %v524_v21 = vstv %s1326_s14 }
  0x9c   :  { %v246_v40 = vstv %s1413_s16  ;;  %s1355_s7 = sld [smem:[#allocation2 + $0x73]]  ;;  %v506_v53 = vadd.f32 %v505_v37, %v502_v48 }
  0x9d   :  { %v532_v54 = vstv %s1331_s30  ;;  %s1360_s0 = sld [smem:[#allocation2 + $0x74]]  ;;  %v247_v15 = vmul.f32 %v763_v45, %v246_v40 }
  0x9e   :  { %v533_v57 = vmul.f32 %v954_v26, %v532_v54  ;;  %v535_v58 = vstv %s1335_s24  ;;  %s1365_s9 = sld [smem:[#allocation2 + $0x75]]  ;;  %v510_v59 = vadd.f32 %v509_v49, %v506_v53 }
  0x9f   :  { %v536_v61 = vmul.f32 %v960_v30, %v535_v58  ;;  %v539_v62 = vstv %s1339_s1  ;;  %s1372_s3 = sld [smem:[#allocation2 + $0x76]]  ;;  %v477_v30 = vstv %s1311_s2  ;;  %v248_v25 = vadd.f32 %v247_v15, %v201_v14 }
  0xa0   :  { %v540_v2 = vmul.f32 %v976_v38, %v539_v62  ;;  %v543_v3 = vstv %s1346_s20  ;;  %s1374_s19 = sld [smem:[#allocation2 + $0x86]]  ;;  %v514_v26 = vadd.f32 %v513_v51, %v510_v59  ;;  %v293_v38 = vstv %s1068_s8 }
  0xa1   :  { %v537_v6 = vadd.f32 %v536_v61, %v533_v57  ;;  %v544_v7 = vmul.f32 %v991_v46, %v543_v3  ;;  %v547_v9 = vstv %s1351_s29  ;;  %s1381_s25 = sld [smem:[#allocation2 + $0x77]]  ;;  %v478_v18 = vadd.f32 %v477_v30, %v475_v1 }
  0xa2   :  { %v551_v10 = vstv %s1355_s7  ;;  %v518_v11 = vadd.f32 %v517_v60, %v514_v26  ;;  %v548_v13 = vmul.f32 %v1008_v56, %v547_v9  ;;  %s1387_s6 = sld [smem:[#allocation2 + $0x87]]  ;;  %v767_v56 = vpop.eup %766  ;;  %v294_v27 = vmul.f32 %v765_v8, %v293_v38 }
  0xa3   :  { %v541_v12 = vadd.f32 %v540_v2, %v537_v6  ;;  %v555_v17 = vstv %s1360_s0  ;;  %v552_v20 = vmul.f32 %v1023_v0, %v551_v10  ;;  %s733_s8 = sld [smem:[#allocation2 + $0x81]]  ;;  %772 = vtanh.f32 %v478_v18  ;;  %v769_v37 = vpop.eup %768 }
  0xa4   :  { %v522_v46 = vadd.f32 %v521_v4, %v518_v11  ;;  %v559_v22 = vstv %s1365_s9  ;;  %v556_v24 = vmul.f32 %v1034_v5, %v555_v17  ;;  %s698_s17 = sld [smem:[#allocation2 + $0x88]]  ;;  %v295_v42 = vadd.f32 %v294_v27, %v248_v25  ;;  %v771_v50 = vpop.eup %770 }
  0xa5   :  { %v545_v19 = vadd.f32 %v544_v7, %v541_v12  ;;  %v563_v29 = vstv %s1372_s3  ;;  %v560_v35 = vmul.f32 %v1052_v16, %v559_v22  ;;  %s710_s10 = sld [smem:[#allocation2 + $0x89]] }
  0xa6   :  { %v525_v32 = vadd.f32 %v524_v21, %v522_v46  ;;  %v340_v0 = vstv %s1374_s19  ;;  %v564_v40 = vmul.f32 %v1074_v33, %v563_v29  ;;  %s722_s13 = sld [smem:[#allocation2 + $0x8a]] }
  0xa7   :  { %v549_v23 = vadd.f32 %v548_v13, %v545_v19  ;;  %v567_v36 = vstv %s1381_s25  ;;  %v341_v5 = vmul.f32 %v767_v56, %v340_v0  ;;  %s734_s18 = sld [smem:[#allocation2 + $0x8b]] }
  0xa8   :  { %774 = vtanh.f32 %v525_v32  ;;  %v568_v45 = vmul.f32 %v1089_v44, %v567_v36  ;;  %v387_v47 = vstv %s1387_s6 }
  0xa9   :  { %v553_v34 = vadd.f32 %v552_v20, %v549_v23  ;;  %v571_v49 = vstv %s733_s8  ;;  %v342_v28 = vadd.f32 %v341_v5, %v295_v42  ;;  %v388_v16 = vmul.f32 %v769_v37, %v387_v47 }
  0xaa   :  { %v434_v31 = vstv %s698_s17 }
  0xab   :  { %v557_v39 = vadd.f32 %v556_v24, %v553_v34  ;;  %v389_v53 = vadd.f32 %v388_v16, %v342_v28  ;;  %v435_v51 = vmul.f32 %v771_v50, %v434_v31  ;;  %v481_v54 = vstv %s710_s10 }
  0xac   :  { %v528_v58 = vstv %s722_s13 }
  0xad   :  { %v561_v43 = vadd.f32 %v560_v35, %v557_v39  ;;  %v436_v55 = vadd.f32 %v435_v51, %v389_v53  ;;  %v575_v61 = vstv %s734_s18 }
  0xaf   :  { %v565_v48 = vadd.f32 %v564_v40, %v561_v43 }
  0xb0   :  { %v773_v33 = vpop.eup %772 }
  0xb1   :  { %v569_v41 = vadd.f32 %v568_v45, %v565_v48  ;;  %v482_v57 = vmul.f32 %v773_v33, %v481_v54 }
  0xb3   :  { %v572_v52 = vadd.f32 %v571_v49, %v569_v41  ;;  %v483_v59 = vadd.f32 %v482_v57, %v436_v55 }
  0xb5   :  { %776 = vtanh.f32 %v572_v52  ;;  %v775_v44 = vpop.eup %774 }
  0xb6   :  { %v529_v60 = vmul.f32 %v775_v44, %v528_v58 }
  0xb8   :  { %v530_v62 = vadd.f32 %v529_v60, %v483_v59 }
  0xc2   :  { %v777_v63 = vpop.eup %776 }
  0xc3   :  { %v576_v1 = vmul.f32 %v777_v63, %v575_v61 }
  0xc5   :  { %v577_v2 = vadd.f32 %v576_v1, %v530_v62 }
  0xc7   :  { %578 = vst [vmem:[#allocation7] sm:$0xff] %v577_v2 }
  0xc8   :  { %817 = shalt.err (!%p814_p9)
}
  0xc9   :  { %s1414_s15 = sld [smem:[#allocation14_spill]] }
  0xcf   :  { %588 = dma.vmem_to_hbm [thread:$0]  %s586_s21, 128, %s1414_s15, [#allocation4]  }
  0xd0   :  { %830 = dma.done.wait [#allocation4], 128  }
  0xd1   :  { %831 = vsyncadd [#allocation4], 4294967168 }
  0xd2   :  { %592 = vsyncpa [#allocation3], 1 }
  0xd3   :  { %593 = vsyncpa [#allocation4], 1 }
  0xd4   :  { %594 = vsyncpa [#allocation5], 1 }

</bundles_post_ra>
